<compile_context>
chip_gen: v5e
topology: v5e:2x2
jax: 0.10.0
libtpu: 0.0.40
codegen_flags: <defaults>
</compile_context>

<pallas_src>
import functools

import jax
import jax.numpy as jnp
from jax.experimental import pallas as pl
from jax.experimental.pallas import tpu as pltpu

BINS = 30
BINS_PAD = 32          # pad bin rows to a sublane multiple for the output block
LANES = 128
TILE_ROWS = 1024       # (1024, 128) f32 = 512 KiB per input block
MOMENTUM = 0.0
LOSS_WEIGHT = 1.0


def _ghmc_tile_kernel(pred_ref, target_ref, cnt_ref, bce_ref, *,
                      tile_rows, n_valid, needs_mask):
    """One row-tile: per-bin element counts and per-bin BCE sums, reduced only
    along the sublane (row) axis (cross-lane reduction is done outside)."""
    pred = pred_ref[...].astype(jnp.float32)          # (tile_rows, 128)
    target = target_ref[...].astype(jnp.float32)

    # gradient-norm proxy and its uniform-bin index (edges are i/BINS)
    g = jnp.abs(jax.nn.sigmoid(pred) - target)
    bin_idx = jnp.minimum(jnp.floor(g * BINS).astype(jnp.int32), BINS - 1)

    if needs_mask:
        # tail padding: send padded elements to a bin id that never matches
        row0 = pl.program_id(0) * tile_rows
        rows = jax.lax.broadcasted_iota(jnp.int32, pred.shape, 0) + row0
        lanes = jax.lax.broadcasted_iota(jnp.int32, pred.shape, 1)
        valid = rows * LANES + lanes < n_valid
        bin_idx = jnp.where(valid, bin_idx, BINS)

    # stable binary_cross_entropy_with_logits (elementwise)
    bce = (jnp.maximum(pred, 0.0) - pred * target
           + jnp.log1p(jnp.exp(-jnp.abs(pred))))

    # 30-bin static loop: 1 compare + 1 cast/select per bin, sublane-axis
    # partial sums only (no per-bin full 2-D reductions).
    for i in range(BINS):
        mask = bin_idx == i
        cnt_ref[i, :] = jnp.sum(mask.astype(jnp.float32), axis=0)
        bce_ref[i, :] = jnp.sum(jnp.where(mask, bce, 0.0), axis=0)

    zero_row = jnp.zeros((LANES,), jnp.float32)
    for i in range(BINS, BINS_PAD):                   # keep padded rows defined
        cnt_ref[i, :] = zero_row
        bce_ref[i, :] = zero_row


def ghmc_loss(pred, target):
    """GHMC forward (use_sigmoid=True, momentum=0). pred/target: [batch, class].
    Returns scalar f32 loss."""
    batch, num_cls = pred.shape
    n_valid = batch * num_cls

    rows = -(-n_valid // LANES)
    if rows <= TILE_ROWS:
        tr, grid_r = rows, 1                          # single block == full array
    else:
        tr = TILE_ROWS
        grid_r = -(-rows // tr)
    rows_pad = grid_r * tr
    n_pad = rows_pad * LANES
    needs_mask = n_pad != n_valid

    def to_tiles(x):
        x = x.reshape(-1)
        if needs_mask:
            x = jnp.pad(x, (0, n_pad - n_valid))
        return x.reshape(rows_pad, LANES)

    pred2 = to_tiles(pred)
    target2 = to_tiles(target)

    kernel = functools.partial(_ghmc_tile_kernel, tile_rows=tr,
                               n_valid=n_valid, needs_mask=needs_mask)

    cnt_part, bce_part = pl.pallas_call(
        kernel,
        out_shape=(jax.ShapeDtypeStruct((BINS_PAD, grid_r * LANES), jnp.float32),
                   jax.ShapeDtypeStruct((BINS_PAD, grid_r * LANES), jnp.float32)),
        grid=(grid_r,),
        in_specs=[pl.BlockSpec((tr, LANES), lambda i: (i, 0)),
                  pl.BlockSpec((tr, LANES), lambda i: (i, 0))],
        out_specs=(pl.BlockSpec((BINS_PAD, LANES), lambda i: (0, i)),
                   pl.BlockSpec((BINS_PAD, LANES), lambda i: (0, i))),
        compiler_params=pltpu.CompilerParams(
            dimension_semantics=("parallel",)),
    )(pred2, target2)

    # Tiny cross-tile / cross-lane combine: O(BINS * num_tiles) work.
    counts = jnp.sum(cnt_part[:BINS], axis=1)         # (30,) global bin counts
    bsums = jnp.sum(bce_part[:BINS], axis=1)          # (30,) global binned BCE sums
    has = counts > 0.0
    n = jnp.sum(has.astype(jnp.float32))
    per_bin = jnp.where(has, bsums / jnp.maximum(counts, 1.0), 0.0)
    # tot (= batch) cancels between w = tot/count and the final division by tot.
    loss = jnp.where(n > 0.0, jnp.sum(per_bin) / jnp.maximum(n, 1.0), 0.0)
    return loss * LOSS_WEIGHT


def _ghmc_ref(pred, target):
    """Pure-JAX reference mirroring the PyTorch forward exactly."""
    pred = pred.astype(jnp.float32)
    target = target.astype(jnp.float32)
    edges = [float(x) / BINS for x in range(BINS + 1)]
    edges[-1] += 1e-06
    g = jnp.abs(jax.nn.sigmoid(pred) - target)
    tot = float(max(pred.shape[0], 1.0))
    weights = jnp.zeros_like(pred)
    n = 0.0
    for i in range(BINS):
        mask = (g >= edges[i]) & (g < edges[i + 1])
        cnt = jnp.sum(mask.astype(jnp.float32))
        has = cnt > 0
        n = n + has.astype(jnp.float32)
        weights = jnp.where(mask & has, tot / jnp.maximum(cnt, 1.0), weights)
    weights = jnp.where(n > 0, weights / jnp.maximum(n, 1.0), weights)
    bce = (jnp.maximum(pred, 0.0) - pred * target
           + jnp.log1p(jnp.exp(-jnp.abs(pred))))
    return jnp.sum(weights * bce) / tot * LOSS_WEIGHT


if __name__ == "__main__":
    key = jax.random.PRNGKey(0)
    k1, k2 = jax.random.split(key)
    batch, num_cls = 16, 32
    pred = jax.random.normal(k1, (batch, num_cls), dtype=jnp.float32) * 2.0
    target = jax.random.bernoulli(k2, 0.3, (batch, num_cls)).astype(jnp.float32)

    loss = ghmc_loss(pred, target)
    jax.block_until_ready(loss)

    ref = _ghmc_ref(pred, target)
    assert jnp.allclose(loss, ref, rtol=1e-4, atol=1e-6), (loss, ref)
    print("KERNEL_OK")
</pallas_src>

<mosaic_0001>
module attributes {stable_mosaic.version = 11 : i64} {
  func.func @_ghmc_tile_kernel(%arg0: i32, %arg1: memref<4x128xf32, #tpu.memory_space<vmem>>, %arg2: memref<4x128xf32, #tpu.memory_space<vmem>>, %arg3: memref<32x128xf32, #tpu.memory_space<vmem>>, %arg4: memref<32x128xf32, #tpu.memory_space<vmem>>) attributes {dimension_semantics = [#tpu.dimension_semantics<parallel>], iteration_bounds = array<i64: 1>, scalar_prefetch = 0 : i64, scratch_operands = 0 : i64, tpu.core_type = #tpu.core_type<tc>, window_params = [{transform_indices = @transform_0, window_bounds = array<i64: 4, 128>}, {transform_indices = @transform_1, window_bounds = array<i64: 4, 128>}, {transform_indices = @transform_2, window_bounds = array<i64: 32, 128>}, {transform_indices = @transform_3, window_bounds = array<i64: 32, 128>}]} {
    %c0 = arith.constant 0 : index
    %c0_0 = arith.constant 0 : index
    %0 = vector.load %arg1[%c0, %c0_0] : memref<4x128xf32, #tpu.memory_space<vmem>>, vector<4x128xf32>
    %c0_1 = arith.constant 0 : index
    %c0_2 = arith.constant 0 : index
    %1 = vector.load %arg2[%c0_1, %c0_2] : memref<4x128xf32, #tpu.memory_space<vmem>>, vector<4x128xf32>
    %2 = arith.negf %0 : vector<4x128xf32>
    %3 = math.exp %2 : vector<4x128xf32>
    %cst = arith.constant 1.000000e+00 : f32
    %4 = vector.broadcast %cst : f32 to vector<4x128xf32>
    %5 = arith.addf %4, %3 : vector<4x128xf32>
    %6 = arith.divf %4, %5 : vector<4x128xf32>
    %7 = arith.subf %6, %1 : vector<4x128xf32>
    %8 = math.absf %7 : vector<4x128xf32>
    %cst_3 = arith.constant 3.000000e+01 : f32
    %9 = vector.broadcast %cst_3 : f32 to vector<4x128xf32>
    %10 = arith.mulf %8, %9 : vector<4x128xf32>
    %11 = math.floor %10 : vector<4x128xf32>
    %12 = arith.fptosi %11 : vector<4x128xf32> to vector<4x128xi32>
    %c29_i32 = arith.constant 29 : i32
    %13 = vector.broadcast %c29_i32 : i32 to vector<4x128xi32>
    %14 = arith.minsi %12, %13 : vector<4x128xi32>
    %cst_4 = arith.constant 0.000000e+00 : f32
    %15 = vector.broadcast %cst_4 : f32 to vector<4x128xf32>
    %16 = arith.maximumf %0, %15 : vector<4x128xf32>
    %17 = arith.mulf %0, %1 : vector<4x128xf32>
    %18 = arith.subf %16, %17 : vector<4x128xf32>
    %19 = math.absf %0 : vector<4x128xf32>
    %cst_5 = arith.constant 0.000000e+00 : f32
    %20 = vector.broadcast %cst_5 : f32 to vector<4x128xf32>
    %21 = arith.subf %20, %19 : vector<4x128xf32>
    %22 = math.exp %21 : vector<4x128xf32>
    %23 = math.log1p %22 : vector<4x128xf32>
    %24 = arith.addf %18, %23 : vector<4x128xf32>
    %c0_i32 = arith.constant 0 : i32
    %25 = vector.broadcast %c0_i32 : i32 to vector<4x128xi32>
    %26 = arith.cmpi eq, %14, %25 : vector<4x128xi32>
    %27 = arith.extui %26 : vector<4x128xi1> to vector<4x128xi32>
    %28 = arith.sitofp %27 : vector<4x128xi32> to vector<4x128xf32>
    %cst_6 = arith.constant dense<0.000000e+00> : vector<128xf32>
    %29 = vector.multi_reduction <add>, %28, %cst_6 [0] : vector<4x128xf32> to vector<128xf32>
    %c0_7 = arith.constant 0 : index
    %c0_8 = arith.constant 0 : index
    %30 = vector.load %arg3[%c0_7, %c0_8] : memref<32x128xf32, #tpu.memory_space<vmem>>, vector<1x128xf32>
    %31 = vector.shape_cast %30 : vector<1x128xf32> to vector<128xf32>
    %32 = vector.shape_cast %29 : vector<128xf32> to vector<1x128xf32>
    tpu.vector_store %arg3[%c0_7, %c0_8], %32 {strides = array<i32>} : memref<32x128xf32, #tpu.memory_space<vmem>>, vector<1x128xf32>,
    %cst_9 = arith.constant 0.000000e+00 : f32
    %33 = vector.broadcast %cst_9 : f32 to vector<4x128xf32>
    %34 = arith.select %26, %24, %33 : vector<4x128xi1>, vector<4x128xf32>
    %cst_10 = arith.constant dense<0.000000e+00> : vector<128xf32>
    %35 = vector.multi_reduction <add>, %34, %cst_10 [0] : vector<4x128xf32> to vector<128xf32>
    %c0_11 = arith.constant 0 : index
    %c0_12 = arith.constant 0 : index
    %36 = vector.load %arg4[%c0_11, %c0_12] : memref<32x128xf32, #tpu.memory_space<vmem>>, vector<1x128xf32>
    %37 = vector.shape_cast %36 : vector<1x128xf32> to vector<128xf32>
    %38 = vector.shape_cast %35 : vector<128xf32> to vector<1x128xf32>
    tpu.vector_store %arg4[%c0_11, %c0_12], %38 {strides = array<i32>} : memref<32x128xf32, #tpu.memory_space<vmem>>, vector<1x128xf32>,
    %c1_i32 = arith.constant 1 : i32
    %39 = vector.broadcast %c1_i32 : i32 to vector<4x128xi32>
    %40 = arith.cmpi eq, %14, %39 : vector<4x128xi32>
    %41 = arith.extui %40 : vector<4x128xi1> to vector<4x128xi32>
    %42 = arith.sitofp %41 : vector<4x128xi32> to vector<4x128xf32>
    %cst_13 = arith.constant dense<0.000000e+00> : vector<128xf32>
    %43 = vector.multi_reduction <add>, %42, %cst_13 [0] : vector<4x128xf32> to vector<128xf32>
    %c1 = arith.constant 1 : index
    %c0_14 = arith.constant 0 : index
    %44 = vector.load %arg3[%c1, %c0_14] : memref<32x128xf32, #tpu.memory_space<vmem>>, vector<1x128xf32>
    %45 = vector.shape_cast %44 : vector<1x128xf32> to vector<128xf32>
    %46 = vector.shape_cast %43 : vector<128xf32> to vector<1x128xf32>
    tpu.vector_store %arg3[%c1, %c0_14], %46 {strides = array<i32>} : memref<32x128xf32, #tpu.memory_space<vmem>>, vector<1x128xf32>,
    %cst_15 = arith.constant 0.000000e+00 : f32
    %47 = vector.broadcast %cst_15 : f32 to vector<4x128xf32>
    %48 = arith.select %40, %24, %47 : vector<4x128xi1>, vector<4x128xf32>
    %cst_16 = arith.constant dense<0.000000e+00> : vector<128xf32>
    %49 = vector.multi_reduction <add>, %48, %cst_16 [0] : vector<4x128xf32> to vector<128xf32>
    %c1_17 = arith.constant 1 : index
    %c0_18 = arith.constant 0 : index
    %50 = vector.load %arg4[%c1_17, %c0_18] : memref<32x128xf32, #tpu.memory_space<vmem>>, vector<1x128xf32>
    %51 = vector.shape_cast %50 : vector<1x128xf32> to vector<128xf32>
    %52 = vector.shape_cast %49 : vector<128xf32> to vector<1x128xf32>
    tpu.vector_store %arg4[%c1_17, %c0_18], %52 {strides = array<i32>} : memref<32x128xf32, #tpu.memory_space<vmem>>, vector<1x128xf32>,
    %c2_i32 = arith.constant 2 : i32
    %53 = vector.broadcast %c2_i32 : i32 to vector<4x128xi32>
    %54 = arith.cmpi eq, %14, %53 : vector<4x128xi32>
    %55 = arith.extui %54 : vector<4x128xi1> to vector<4x128xi32>
    %56 = arith.sitofp %55 : vector<4x128xi32> to vector<4x128xf32>
    %cst_19 = arith.constant dense<0.000000e+00> : vector<128xf32>
    %57 = vector.multi_reduction <add>, %56, %cst_19 [0] : vector<4x128xf32> to vector<128xf32>
    %c2 = arith.constant 2 : index
    %c0_20 = arith.constant 0 : index
    %58 = vector.load %arg3[%c2, %c0_20] : memref<32x128xf32, #tpu.memory_space<vmem>>, vector<1x128xf32>
    %59 = vector.shape_cast %58 : vector<1x128xf32> to vector<128xf32>
    %60 = vector.shape_cast %57 : vector<128xf32> to vector<1x128xf32>
    tpu.vector_store %arg3[%c2, %c0_20], %60 {strides = array<i32>} : memref<32x128xf32, #tpu.memory_space<vmem>>, vector<1x128xf32>,
    %cst_21 = arith.constant 0.000000e+00 : f32
    %61 = vector.broadcast %cst_21 : f32 to vector<4x128xf32>
    %62 = arith.select %54, %24, %61 : vector<4x128xi1>, vector<4x128xf32>
    %cst_22 = arith.constant dense<0.000000e+00> : vector<128xf32>
    %63 = vector.multi_reduction <add>, %62, %cst_22 [0] : vector<4x128xf32> to vector<128xf32>
    %c2_23 = arith.constant 2 : index
    %c0_24 = arith.constant 0 : index
    %64 = vector.load %arg4[%c2_23, %c0_24] : memref<32x128xf32, #tpu.memory_space<vmem>>, vector<1x128xf32>
    %65 = vector.shape_cast %64 : vector<1x128xf32> to vector<128xf32>
    %66 = vector.shape_cast %63 : vector<128xf32> to vector<1x128xf32>
    tpu.vector_store %arg4[%c2_23, %c0_24], %66 {strides = array<i32>} : memref<32x128xf32, #tpu.memory_space<vmem>>, vector<1x128xf32>,
    %c3_i32 = arith.constant 3 : i32
    %67 = vector.broadcast %c3_i32 : i32 to vector<4x128xi32>
    %68 = arith.cmpi eq, %14, %67 : vector<4x128xi32>
    %69 = arith.extui %68 : vector<4x128xi1> to vector<4x128xi32>
    %70 = arith.sitofp %69 : vector<4x128xi32> to vector<4x128xf32>
    %cst_25 = arith.constant dense<0.000000e+00> : vector<128xf32>
    %71 = vector.multi_reduction <add>, %70, %cst_25 [0] : vector<4x128xf32> to vector<128xf32>
    %c3 = arith.constant 3 : index
    %c0_26 = arith.constant 0 : index
    %72 = vector.load %arg3[%c3, %c0_26] : memref<32x128xf32, #tpu.memory_space<vmem>>, vector<1x128xf32>
    %73 = vector.shape_cast %72 : vector<1x128xf32> to vector<128xf32>
    %74 = vector.shape_cast %71 : vector<128xf32> to vector<1x128xf32>
    tpu.vector_store %arg3[%c3, %c0_26], %74 {strides = array<i32>} : memref<32x128xf32, #tpu.memory_space<vmem>>, vector<1x128xf32>,
    %cst_27 = arith.constant 0.000000e+00 : f32
    %75 = vector.broadcast %cst_27 : f32 to vector<4x128xf32>
    %76 = arith.select %68, %24, %75 : vector<4x128xi1>, vector<4x128xf32>
    %cst_28 = arith.constant dense<0.000000e+00> : vector<128xf32>
    %77 = vector.multi_reduction <add>, %76, %cst_28 [0] : vector<4x128xf32> to vector<128xf32>
    %c3_29 = arith.constant 3 : index
    %c0_30 = arith.constant 0 : index
    %78 = vector.load %arg4[%c3_29, %c0_30] : memref<32x128xf32, #tpu.memory_space<vmem>>, vector<1x128xf32>
    %79 = vector.shape_cast %78 : vector<1x128xf32> to vector<128xf32>
    %80 = vector.shape_cast %77 : vector<128xf32> to vector<1x128xf32>
    tpu.vector_store %arg4[%c3_29, %c0_30], %80 {strides = array<i32>} : memref<32x128xf32, #tpu.memory_space<vmem>>, vector<1x128xf32>,
    %c4_i32 = arith.constant 4 : i32
    %81 = vector.broadcast %c4_i32 : i32 to vector<4x128xi32>
    %82 = arith.cmpi eq, %14, %81 : vector<4x128xi32>
    %83 = arith.extui %82 : vector<4x128xi1> to vector<4x128xi32>
    %84 = arith.sitofp %83 : vector<4x128xi32> to vector<4x128xf32>
    %cst_31 = arith.constant dense<0.000000e+00> : vector<128xf32>
    %85 = vector.multi_reduction <add>, %84, %cst_31 [0] : vector<4x128xf32> to vector<128xf32>
    %c4 = arith.constant 4 : index
    %c0_32 = arith.constant 0 : index
    %86 = vector.load %arg3[%c4, %c0_32] : memref<32x128xf32, #tpu.memory_space<vmem>>, vector<1x128xf32>
    %87 = vector.shape_cast %86 : vector<1x128xf32> to vector<128xf32>
    %88 = vector.shape_cast %85 : vector<128xf32> to vector<1x128xf32>
    tpu.vector_store %arg3[%c4, %c0_32], %88 {strides = array<i32>} : memref<32x128xf32, #tpu.memory_space<vmem>>, vector<1x128xf32>,
    %cst_33 = arith.constant 0.000000e+00 : f32
    %89 = vector.broadcast %cst_33 : f32 to vector<4x128xf32>
    %90 = arith.select %82, %24, %89 : vector<4x128xi1>, vector<4x128xf32>
    %cst_34 = arith.constant dense<0.000000e+00> : vector<128xf32>
    %91 = vector.multi_reduction <add>, %90, %cst_34 [0] : vector<4x128xf32> to vector<128xf32>
    %c4_35 = arith.constant 4 : index
    %c0_36 = arith.constant 0 : index
    %92 = vector.load %arg4[%c4_35, %c0_36] : memref<32x128xf32, #tpu.memory_space<vmem>>, vector<1x128xf32>
    %93 = vector.shape_cast %92 : vector<1x128xf32> to vector<128xf32>
    %94 = vector.shape_cast %91 : vector<128xf32> to vector<1x128xf32>
    tpu.vector_store %arg4[%c4_35, %c0_36], %94 {strides = array<i32>} : memref<32x128xf32, #tpu.memory_space<vmem>>, vector<1x128xf32>,
    %c5_i32 = arith.constant 5 : i32
    %95 = vector.broadcast %c5_i32 : i32 to vector<4x128xi32>
    %96 = arith.cmpi eq, %14, %95 : vector<4x128xi32>
    %97 = arith.extui %96 : vector<4x128xi1> to vector<4x128xi32>
    %98 = arith.sitofp %97 : vector<4x128xi32> to vector<4x128xf32>
    %cst_37 = arith.constant dense<0.000000e+00> : vector<128xf32>
    %99 = vector.multi_reduction <add>, %98, %cst_37 [0] : vector<4x128xf32> to vector<128xf32>
    %c5 = arith.constant 5 : index
    %c0_38 = arith.constant 0 : index
    %100 = vector.load %arg3[%c5, %c0_38] : memref<32x128xf32, #tpu.memory_space<vmem>>, vector<1x128xf32>
    %101 = vector.shape_cast %100 : vector<1x128xf32> to vector<128xf32>
    %102 = vector.shape_cast %99 : vector<128xf32> to vector<1x128xf32>
    tpu.vector_store %arg3[%c5, %c0_38], %102 {strides = array<i32>} : memref<32x128xf32, #tpu.memory_space<vmem>>, vector<1x128xf32>,
    %cst_39 = arith.constant 0.000000e+00 : f32
    %103 = vector.broadcast %cst_39 : f32 to vector<4x128xf32>
    %104 = arith.select %96, %24, %103 : vector<4x128xi1>, vector<4x128xf32>
    %cst_40 = arith.constant dense<0.000000e+00> : vector<128xf32>
    %105 = vector.multi_reduction <add>, %104, %cst_40 [0] : vector<4x128xf32> to vector<128xf32>
    %c5_41 = arith.constant 5 : index
    %c0_42 = arith.constant 0 : index
    %106 = vector.load %arg4[%c5_41, %c0_42] : memref<32x128xf32, #tpu.memory_space<vmem>>, vector<1x128xf32>
    %107 = vector.shape_cast %106 : vector<1x128xf32> to vector<128xf32>
    %108 = vector.shape_cast %105 : vector<128xf32> to vector<1x128xf32>
    tpu.vector_store %arg4[%c5_41, %c0_42], %108 {strides = array<i32>} : memref<32x128xf32, #tpu.memory_space<vmem>>, vector<1x128xf32>,
    %c6_i32 = arith.constant 6 : i32
    %109 = vector.broadcast %c6_i32 : i32 to vector<4x128xi32>
    %110 = arith.cmpi eq, %14, %109 : vector<4x128xi32>
    %111 = arith.extui %110 : vector<4x128xi1> to vector<4x128xi32>
    %112 = arith.sitofp %111 : vector<4x128xi32> to vector<4x128xf32>
    %cst_43 = arith.constant dense<0.000000e+00> : vector<128xf32>
    %113 = vector.multi_reduction <add>, %112, %cst_43 [0] : vector<4x128xf32> to vector<128xf32>
    %c6 = arith.constant 6 : index
    %c0_44 = arith.constant 0 : index
    %114 = vector.load %arg3[%c6, %c0_44] : memref<32x128xf32, #tpu.memory_space<vmem>>, vector<1x128xf32>
    %115 = vector.shape_cast %114 : vector<1x128xf32> to vector<128xf32>
    %116 = vector.shape_cast %113 : vector<128xf32> to vector<1x128xf32>
    tpu.vector_store %arg3[%c6, %c0_44], %116 {strides = array<i32>} : memref<32x128xf32, #tpu.memory_space<vmem>>, vector<1x128xf32>,
    %cst_45 = arith.constant 0.000000e+00 : f32
    %117 = vector.broadcast %cst_45 : f32 to vector<4x128xf32>
    %118 = arith.select %110, %24, %117 : vector<4x128xi1>, vector<4x128xf32>
    %cst_46 = arith.constant dense<0.000000e+00> : vector<128xf32>
    %119 = vector.multi_reduction <add>, %118, %cst_46 [0] : vector<4x128xf32> to vector<128xf32>
    %c6_47 = arith.constant 6 : index
    %c0_48 = arith.constant 0 : index
    %120 = vector.load %arg4[%c6_47, %c0_48] : memref<32x128xf32, #tpu.memory_space<vmem>>, vector<1x128xf32>
    %121 = vector.shape_cast %120 : vector<1x128xf32> to vector<128xf32>
    %122 = vector.shape_cast %119 : vector<128xf32> to vector<1x128xf32>
    tpu.vector_store %arg4[%c6_47, %c0_48], %122 {strides = array<i32>} : memref<32x128xf32, #tpu.memory_space<vmem>>, vector<1x128xf32>,
    %c7_i32 = arith.constant 7 : i32
    %123 = vector.broadcast %c7_i32 : i32 to vector<4x128xi32>
    %124 = arith.cmpi eq, %14, %123 : vector<4x128xi32>
    %125 = arith.extui %124 : vector<4x128xi1> to vector<4x128xi32>
    %126 = arith.sitofp %125 : vector<4x128xi32> to vector<4x128xf32>
    %cst_49 = arith.constant dense<0.000000e+00> : vector<128xf32>
    %127 = vector.multi_reduction <add>, %126, %cst_49 [0] : vector<4x128xf32> to vector<128xf32>
    %c7 = arith.constant 7 : index
    %c0_50 = arith.constant 0 : index
    %128 = vector.load %arg3[%c7, %c0_50] : memref<32x128xf32, #tpu.memory_space<vmem>>, vector<1x128xf32>
    %129 = vector.shape_cast %128 : vector<1x128xf32> to vector<128xf32>
    %130 = vector.shape_cast %127 : vector<128xf32> to vector<1x128xf32>
    tpu.vector_store %arg3[%c7, %c0_50], %130 {strides = array<i32>} : memref<32x128xf32, #tpu.memory_space<vmem>>, vector<1x128xf32>,
    %cst_51 = arith.constant 0.000000e+00 : f32
    %131 = vector.broadcast %cst_51 : f32 to vector<4x128xf32>
    %132 = arith.select %124, %24, %131 : vector<4x128xi1>, vector<4x128xf32>
    %cst_52 = arith.constant dense<0.000000e+00> : vector<128xf32>
    %133 = vector.multi_reduction <add>, %132, %cst_52 [0] : vector<4x128xf32> to vector<128xf32>
    %c7_53 = arith.constant 7 : index
    %c0_54 = arith.constant 0 : index
    %134 = vector.load %arg4[%c7_53, %c0_54] : memref<32x128xf32, #tpu.memory_space<vmem>>, vector<1x128xf32>
    %135 = vector.shape_cast %134 : vector<1x128xf32> to vector<128xf32>
    %136 = vector.shape_cast %133 : vector<128xf32> to vector<1x128xf32>
    tpu.vector_store %arg4[%c7_53, %c0_54], %136 {strides = array<i32>} : memref<32x128xf32, #tpu.memory_space<vmem>>, vector<1x128xf32>,
    %c8_i32 = arith.constant 8 : i32
    %137 = vector.broadcast %c8_i32 : i32 to vector<4x128xi32>
    %138 = arith.cmpi eq, %14, %137 : vector<4x128xi32>
    %139 = arith.extui %138 : vector<4x128xi1> to vector<4x128xi32>
    %140 = arith.sitofp %139 : vector<4x128xi32> to vector<4x128xf32>
    %cst_55 = arith.constant dense<0.000000e+00> : vector<128xf32>
    %141 = vector.multi_reduction <add>, %140, %cst_55 [0] : vector<4x128xf32> to vector<128xf32>
    %c8 = arith.constant 8 : index
    %c0_56 = arith.constant 0 : index
    %142 = vector.load %arg3[%c8, %c0_56] : memref<32x128xf32, #tpu.memory_space<vmem>>, vector<1x128xf32>
    %143 = vector.shape_cast %142 : vector<1x128xf32> to vector<128xf32>
    %144 = vector.shape_cast %141 : vector<128xf32> to vector<1x128xf32>
    tpu.vector_store %arg3[%c8, %c0_56], %144 {strides = array<i32>} : memref<32x128xf32, #tpu.memory_space<vmem>>, vector<1x128xf32>,
    %cst_57 = arith.constant 0.000000e+00 : f32
    %145 = vector.broadcast %cst_57 : f32 to vector<4x128xf32>
    %146 = arith.select %138, %24, %145 : vector<4x128xi1>, vector<4x128xf32>
    %cst_58 = arith.constant dense<0.000000e+00> : vector<128xf32>
    %147 = vector.multi_reduction <add>, %146, %cst_58 [0] : vector<4x128xf32> to vector<128xf32>
    %c8_59 = arith.constant 8 : index
    %c0_60 = arith.constant 0 : index
    %148 = vector.load %arg4[%c8_59, %c0_60] : memref<32x128xf32, #tpu.memory_space<vmem>>, vector<1x128xf32>
    %149 = vector.shape_cast %148 : vector<1x128xf32> to vector<128xf32>
    %150 = vector.shape_cast %147 : vector<128xf32> to vector<1x128xf32>
    tpu.vector_store %arg4[%c8_59, %c0_60], %150 {strides = array<i32>} : memref<32x128xf32, #tpu.memory_space<vmem>>, vector<1x128xf32>,
    %c9_i32 = arith.constant 9 : i32
    %151 = vector.broadcast %c9_i32 : i32 to vector<4x128xi32>
    %152 = arith.cmpi eq, %14, %151 : vector<4x128xi32>
    %153 = arith.extui %152 : vector<4x128xi1> to vector<4x128xi32>
    %154 = arith.sitofp %153 : vector<4x128xi32> to vector<4x128xf32>
    %cst_61 = arith.constant dense<0.000000e+00> : vector<128xf32>
    %155 = vector.multi_reduction <add>, %154, %cst_61 [0] : vector<4x128xf32> to vector<128xf32>
    %c9 = arith.constant 9 : index
    %c0_62 = arith.constant 0 : index
    %156 = vector.load %arg3[%c9, %c0_62] : memref<32x128xf32, #tpu.memory_space<vmem>>, vector<1x128xf32>
    %157 = vector.shape_cast %156 : vector<1x128xf32> to vector<128xf32>
    %158 = vector.shape_cast %155 : vector<128xf32> to vector<1x128xf32>
    tpu.vector_store %arg3[%c9, %c0_62], %158 {strides = array<i32>} : memref<32x128xf32, #tpu.memory_space<vmem>>, vector<1x128xf32>,
    %cst_63 = arith.constant 0.000000e+00 : f32
    %159 = vector.broadcast %cst_63 : f32 to vector<4x128xf32>
    %160 = arith.select %152, %24, %159 : vector<4x128xi1>, vector<4x128xf32>
    %cst_64 = arith.constant dense<0.000000e+00> : vector<128xf32>
    %161 = vector.multi_reduction <add>, %160, %cst_64 [0] : vector<4x128xf32> to vector<128xf32>
    %c9_65 = arith.constant 9 : index
    %c0_66 = arith.constant 0 : index
    %162 = vector.load %arg4[%c9_65, %c0_66] : memref<32x128xf32, #tpu.memory_space<vmem>>, vector<1x128xf32>
    %163 = vector.shape_cast %162 : vector<1x128xf32> to vector<128xf32>
    %164 = vector.shape_cast %161 : vector<128xf32> to vector<1x128xf32>
    tpu.vector_store %arg4[%c9_65, %c0_66], %164 {strides = array<i32>} : memref<32x128xf32, #tpu.memory_space<vmem>>, vector<1x128xf32>,
    %c10_i32 = arith.constant 10 : i32
    %165 = vector.broadcast %c10_i32 : i32 to vector<4x128xi32>
    %166 = arith.cmpi eq, %14, %165 : vector<4x128xi32>
    %167 = arith.extui %166 : vector<4x128xi1> to vector<4x128xi32>
    %168 = arith.sitofp %167 : vector<4x128xi32> to vector<4x128xf32>
    %cst_67 = arith.constant dense<0.000000e+00> : vector<128xf32>
    %169 = vector.multi_reduction <add>, %168, %cst_67 [0] : vector<4x128xf32> to vector<128xf32>
    %c10 = arith.constant 10 : index
    %c0_68 = arith.constant 0 : index
    %170 = vector.load %arg3[%c10, %c0_68] : memref<32x128xf32, #tpu.memory_space<vmem>>, vector<1x128xf32>
    %171 = vector.shape_cast %170 : vector<1x128xf32> to vector<128xf32>
    %172 = vector.shape_cast %169 : vector<128xf32> to vector<1x128xf32>
    tpu.vector_store %arg3[%c10, %c0_68], %172 {strides = array<i32>} : memref<32x128xf32, #tpu.memory_space<vmem>>, vector<1x128xf32>,
    %cst_69 = arith.constant 0.000000e+00 : f32
    %173 = vector.broadcast %cst_69 : f32 to vector<4x128xf32>
    %174 = arith.select %166, %24, %173 : vector<4x128xi1>, vector<4x128xf32>
    %cst_70 = arith.constant dense<0.000000e+00> : vector<128xf32>
    %175 = vector.multi_reduction <add>, %174, %cst_70 [0] : vector<4x128xf32> to vector<128xf32>
    %c10_71 = arith.constant 10 : index
    %c0_72 = arith.constant 0 : index
    %176 = vector.load %arg4[%c10_71, %c0_72] : memref<32x128xf32, #tpu.memory_space<vmem>>, vector<1x128xf32>
    %177 = vector.shape_cast %176 : vector<1x128xf32> to vector<128xf32>
    %178 = vector.shape_cast %175 : vector<128xf32> to vector<1x128xf32>
    tpu.vector_store %arg4[%c10_71, %c0_72], %178 {strides = array<i32>} : memref<32x128xf32, #tpu.memory_space<vmem>>, vector<1x128xf32>,
    %c11_i32 = arith.constant 11 : i32
    %179 = vector.broadcast %c11_i32 : i32 to vector<4x128xi32>
    %180 = arith.cmpi eq, %14, %179 : vector<4x128xi32>
    %181 = arith.extui %180 : vector<4x128xi1> to vector<4x128xi32>
    %182 = arith.sitofp %181 : vector<4x128xi32> to vector<4x128xf32>
    %cst_73 = arith.constant dense<0.000000e+00> : vector<128xf32>
    %183 = vector.multi_reduction <add>, %182, %cst_73 [0] : vector<4x128xf32> to vector<128xf32>
    %c11 = arith.constant 11 : index
    %c0_74 = arith.constant 0 : index
    %184 = vector.load %arg3[%c11, %c0_74] : memref<32x128xf32, #tpu.memory_space<vmem>>, vector<1x128xf32>
    %185 = vector.shape_cast %184 : vector<1x128xf32> to vector<128xf32>
    %186 = vector.shape_cast %183 : vector<128xf32> to vector<1x128xf32>
    tpu.vector_store %arg3[%c11, %c0_74], %186 {strides = array<i32>} : memref<32x128xf32, #tpu.memory_space<vmem>>, vector<1x128xf32>,
    %cst_75 = arith.constant 0.000000e+00 : f32
    %187 = vector.broadcast %cst_75 : f32 to vector<4x128xf32>
    %188 = arith.select %180, %24, %187 : vector<4x128xi1>, vector<4x128xf32>
    %cst_76 = arith.constant dense<0.000000e+00> : vector<128xf32>
    %189 = vector.multi_reduction <add>, %188, %cst_76 [0] : vector<4x128xf32> to vector<128xf32>
    %c11_77 = arith.constant 11 : index
    %c0_78 = arith.constant 0 : index
    %190 = vector.load %arg4[%c11_77, %c0_78] : memref<32x128xf32, #tpu.memory_space<vmem>>, vector<1x128xf32>
    %191 = vector.shape_cast %190 : vector<1x128xf32> to vector<128xf32>
    %192 = vector.shape_cast %189 : vector<128xf32> to vector<1x128xf32>
    tpu.vector_store %arg4[%c11_77, %c0_78], %192 {strides = array<i32>} : memref<32x128xf32, #tpu.memory_space<vmem>>, vector<1x128xf32>,
    %c12_i32 = arith.constant 12 : i32
    %193 = vector.broadcast %c12_i32 : i32 to vector<4x128xi32>
    %194 = arith.cmpi eq, %14, %193 : vector<4x128xi32>
    %195 = arith.extui %194 : vector<4x128xi1> to vector<4x128xi32>
    %196 = arith.sitofp %195 : vector<4x128xi32> to vector<4x128xf32>
    %cst_79 = arith.constant dense<0.000000e+00> : vector<128xf32>
    %197 = vector.multi_reduction <add>, %196, %cst_79 [0] : vector<4x128xf32> to vector<128xf32>
    %c12 = arith.constant 12 : index
    %c0_80 = arith.constant 0 : index
    %198 = vector.load %arg3[%c12, %c0_80] : memref<32x128xf32, #tpu.memory_space<vmem>>, vector<1x128xf32>
    %199 = vector.shape_cast %198 : vector<1x128xf32> to vector<128xf32>
    %200 = vector.shape_cast %197 : vector<128xf32> to vector<1x128xf32>
    tpu.vector_store %arg3[%c12, %c0_80], %200 {strides = array<i32>} : memref<32x128xf32, #tpu.memory_space<vmem>>, vector<1x128xf32>,
    %cst_81 = arith.constant 0.000000e+00 : f32
    %201 = vector.broadcast %cst_81 : f32 to vector<4x128xf32>
    %202 = arith.select %194, %24, %201 : vector<4x128xi1>, vector<4x128xf32>
    %cst_82 = arith.constant dense<0.000000e+00> : vector<128xf32>
    %203 = vector.multi_reduction <add>, %202, %cst_82 [0] : vector<4x128xf32> to vector<128xf32>
    %c12_83 = arith.constant 12 : index
    %c0_84 = arith.constant 0 : index
    %204 = vector.load %arg4[%c12_83, %c0_84] : memref<32x128xf32, #tpu.memory_space<vmem>>, vector<1x128xf32>
    %205 = vector.shape_cast %204 : vector<1x128xf32> to vector<128xf32>
    %206 = vector.shape_cast %203 : vector<128xf32> to vector<1x128xf32>
    tpu.vector_store %arg4[%c12_83, %c0_84], %206 {strides = array<i32>} : memref<32x128xf32, #tpu.memory_space<vmem>>, vector<1x128xf32>,
    %c13_i32 = arith.constant 13 : i32
    %207 = vector.broadcast %c13_i32 : i32 to vector<4x128xi32>
    %208 = arith.cmpi eq, %14, %207 : vector<4x128xi32>
    %209 = arith.extui %208 : vector<4x128xi1> to vector<4x128xi32>
    %210 = arith.sitofp %209 : vector<4x128xi32> to vector<4x128xf32>
    %cst_85 = arith.constant dense<0.000000e+00> : vector<128xf32>
    %211 = vector.multi_reduction <add>, %210, %cst_85 [0] : vector<4x128xf32> to vector<128xf32>
    %c13 = arith.constant 13 : index
    %c0_86 = arith.constant 0 : index
    %212 = vector.load %arg3[%c13, %c0_86] : memref<32x128xf32, #tpu.memory_space<vmem>>, vector<1x128xf32>
    %213 = vector.shape_cast %212 : vector<1x128xf32> to vector<128xf32>
    %214 = vector.shape_cast %211 : vector<128xf32> to vector<1x128xf32>
    tpu.vector_store %arg3[%c13, %c0_86], %214 {strides = array<i32>} : memref<32x128xf32, #tpu.memory_space<vmem>>, vector<1x128xf32>,
    %cst_87 = arith.constant 0.000000e+00 : f32
    %215 = vector.broadcast %cst_87 : f32 to vector<4x128xf32>
    %216 = arith.select %208, %24, %215 : vector<4x128xi1>, vector<4x128xf32>
    %cst_88 = arith.constant dense<0.000000e+00> : vector<128xf32>
    %217 = vector.multi_reduction <add>, %216, %cst_88 [0] : vector<4x128xf32> to vector<128xf32>
    %c13_89 = arith.constant 13 : index
    %c0_90 = arith.constant 0 : index
    %218 = vector.load %arg4[%c13_89, %c0_90] : memref<32x128xf32, #tpu.memory_space<vmem>>, vector<1x128xf32>
    %219 = vector.shape_cast %218 : vector<1x128xf32> to vector<128xf32>
    %220 = vector.shape_cast %217 : vector<128xf32> to vector<1x128xf32>
    tpu.vector_store %arg4[%c13_89, %c0_90], %220 {strides = array<i32>} : memref<32x128xf32, #tpu.memory_space<vmem>>, vector<1x128xf32>,
    %c14_i32 = arith.constant 14 : i32
    %221 = vector.broadcast %c14_i32 : i32 to vector<4x128xi32>
    %222 = arith.cmpi eq, %14, %221 : vector<4x128xi32>
    %223 = arith.extui %222 : vector<4x128xi1> to vector<4x128xi32>
    %224 = arith.sitofp %223 : vector<4x128xi32> to vector<4x128xf32>
    %cst_91 = arith.constant dense<0.000000e+00> : vector<128xf32>
    %225 = vector.multi_reduction <add>, %224, %cst_91 [0] : vector<4x128xf32> to vector<128xf32>
    %c14 = arith.constant 14 : index
    %c0_92 = arith.constant 0 : index
    %226 = vector.load %arg3[%c14, %c0_92] : memref<32x128xf32, #tpu.memory_space<vmem>>, vector<1x128xf32>
    %227 = vector.shape_cast %226 : vector<1x128xf32> to vector<128xf32>
    %228 = vector.shape_cast %225 : vector<128xf32> to vector<1x128xf32>
    tpu.vector_store %arg3[%c14, %c0_92], %228 {strides = array<i32>} : memref<32x128xf32, #tpu.memory_space<vmem>>, vector<1x128xf32>,
    %cst_93 = arith.constant 0.000000e+00 : f32
    %229 = vector.broadcast %cst_93 : f32 to vector<4x128xf32>
    %230 = arith.select %222, %24, %229 : vector<4x128xi1>, vector<4x128xf32>
    %cst_94 = arith.constant dense<0.000000e+00> : vector<128xf32>
    %231 = vector.multi_reduction <add>, %230, %cst_94 [0] : vector<4x128xf32> to vector<128xf32>
    %c14_95 = arith.constant 14 : index
    %c0_96 = arith.constant 0 : index
    %232 = vector.load %arg4[%c14_95, %c0_96] : memref<32x128xf32, #tpu.memory_space<vmem>>, vector<1x128xf32>
    %233 = vector.shape_cast %232 : vector<1x128xf32> to vector<128xf32>
    %234 = vector.shape_cast %231 : vector<128xf32> to vector<1x128xf32>
    tpu.vector_store %arg4[%c14_95, %c0_96], %234 {strides = array<i32>} : memref<32x128xf32, #tpu.memory_space<vmem>>, vector<1x128xf32>,
    %c15_i32 = arith.constant 15 : i32
    %235 = vector.broadcast %c15_i32 : i32 to vector<4x128xi32>
    %236 = arith.cmpi eq, %14, %235 : vector<4x128xi32>
    %237 = arith.extui %236 : vector<4x128xi1> to vector<4x128xi32>
    %238 = arith.sitofp %237 : vector<4x128xi32> to vector<4x128xf32>
    %cst_97 = arith.constant dense<0.000000e+00> : vector<128xf32>
    %239 = vector.multi_reduction <add>, %238, %cst_97 [0] : vector<4x128xf32> to vector<128xf32>
    %c15 = arith.constant 15 : index
    %c0_98 = arith.constant 0 : index
    %240 = vector.load %arg3[%c15, %c0_98] : memref<32x128xf32, #tpu.memory_space<vmem>>, vector<1x128xf32>
    %241 = vector.shape_cast %240 : vector<1x128xf32> to vector<128xf32>
    %242 = vector.shape_cast %239 : vector<128xf32> to vector<1x128xf32>
    tpu.vector_store %arg3[%c15, %c0_98], %242 {strides = array<i32>} : memref<32x128xf32, #tpu.memory_space<vmem>>, vector<1x128xf32>,
    %cst_99 = arith.constant 0.000000e+00 : f32
    %243 = vector.broadcast %cst_99 : f32 to vector<4x128xf32>
    %244 = arith.select %236, %24, %243 : vector<4x128xi1>, vector<4x128xf32>
    %cst_100 = arith.constant dense<0.000000e+00> : vector<128xf32>
    %245 = vector.multi_reduction <add>, %244, %cst_100 [0] : vector<4x128xf32> to vector<128xf32>
    %c15_101 = arith.constant 15 : index
    %c0_102 = arith.constant 0 : index
    %246 = vector.load %arg4[%c15_101, %c0_102] : memref<32x128xf32, #tpu.memory_space<vmem>>, vector<1x128xf32>
    %247 = vector.shape_cast %246 : vector<1x128xf32> to vector<128xf32>
    %248 = vector.shape_cast %245 : vector<128xf32> to vector<1x128xf32>
    tpu.vector_store %arg4[%c15_101, %c0_102], %248 {strides = array<i32>} : memref<32x128xf32, #tpu.memory_space<vmem>>, vector<1x128xf32>,
    %c16_i32 = arith.constant 16 : i32
    %249 = vector.broadcast %c16_i32 : i32 to vector<4x128xi32>
    %250 = arith.cmpi eq, %14, %249 : vector<4x128xi32>
    %251 = arith.extui %250 : vector<4x128xi1> to vector<4x128xi32>
    %252 = arith.sitofp %251 : vector<4x128xi32> to vector<4x128xf32>
    %cst_103 = arith.constant dense<0.000000e+00> : vector<128xf32>
    %253 = vector.multi_reduction <add>, %252, %cst_103 [0] : vector<4x128xf32> to vector<128xf32>
    %c16 = arith.constant 16 : index
    %c0_104 = arith.constant 0 : index
    %254 = vector.load %arg3[%c16, %c0_104] : memref<32x128xf32, #tpu.memory_space<vmem>>, vector<1x128xf32>
    %255 = vector.shape_cast %254 : vector<1x128xf32> to vector<128xf32>
    %256 = vector.shape_cast %253 : vector<128xf32> to vector<1x128xf32>
    tpu.vector_store %arg3[%c16, %c0_104], %256 {strides = array<i32>} : memref<32x128xf32, #tpu.memory_space<vmem>>, vector<1x128xf32>,
    %cst_105 = arith.constant 0.000000e+00 : f32
    %257 = vector.broadcast %cst_105 : f32 to vector<4x128xf32>
    %258 = arith.select %250, %24, %257 : vector<4x128xi1>, vector<4x128xf32>
    %cst_106 = arith.constant dense<0.000000e+00> : vector<128xf32>
    %259 = vector.multi_reduction <add>, %258, %cst_106 [0] : vector<4x128xf32> to vector<128xf32>
    %c16_107 = arith.constant 16 : index
    %c0_108 = arith.constant 0 : index
    %260 = vector.load %arg4[%c16_107, %c0_108] : memref<32x128xf32, #tpu.memory_space<vmem>>, vector<1x128xf32>
    %261 = vector.shape_cast %260 : vector<1x128xf32> to vector<128xf32>
    %262 = vector.shape_cast %259 : vector<128xf32> to vector<1x128xf32>
    tpu.vector_store %arg4[%c16_107, %c0_108], %262 {strides = array<i32>} : memref<32x128xf32, #tpu.memory_space<vmem>>, vector<1x128xf32>,
    %c17_i32 = arith.constant 17 : i32
    %263 = vector.broadcast %c17_i32 : i32 to vector<4x128xi32>
    %264 = arith.cmpi eq, %14, %263 : vector<4x128xi32>
    %265 = arith.extui %264 : vector<4x128xi1> to vector<4x128xi32>
    %266 = arith.sitofp %265 : vector<4x128xi32> to vector<4x128xf32>
    %cst_109 = arith.constant dense<0.000000e+00> : vector<128xf32>
    %267 = vector.multi_reduction <add>, %266, %cst_109 [0] : vector<4x128xf32> to vector<128xf32>
    %c17 = arith.constant 17 : index
    %c0_110 = arith.constant 0 : index
    %268 = vector.load %arg3[%c17, %c0_110] : memref<32x128xf32, #tpu.memory_space<vmem>>, vector<1x128xf32>
    %269 = vector.shape_cast %268 : vector<1x128xf32> to vector<128xf32>
    %270 = vector.shape_cast %267 : vector<128xf32> to vector<1x128xf32>
    tpu.vector_store %arg3[%c17, %c0_110], %270 {strides = array<i32>} : memref<32x128xf32, #tpu.memory_space<vmem>>, vector<1x128xf32>,
    %cst_111 = arith.constant 0.000000e+00 : f32
    %271 = vector.broadcast %cst_111 : f32 to vector<4x128xf32>
    %272 = arith.select %264, %24, %271 : vector<4x128xi1>, vector<4x128xf32>
    %cst_112 = arith.constant dense<0.000000e+00> : vector<128xf32>
    %273 = vector.multi_reduction <add>, %272, %cst_112 [0] : vector<4x128xf32> to vector<128xf32>
    %c17_113 = arith.constant 17 : index
    %c0_114 = arith.constant 0 : index
    %274 = vector.load %arg4[%c17_113, %c0_114] : memref<32x128xf32, #tpu.memory_space<vmem>>, vector<1x128xf32>
    %275 = vector.shape_cast %274 : vector<1x128xf32> to vector<128xf32>
    %276 = vector.shape_cast %273 : vector<128xf32> to vector<1x128xf32>
    tpu.vector_store %arg4[%c17_113, %c0_114], %276 {strides = array<i32>} : memref<32x128xf32, #tpu.memory_space<vmem>>, vector<1x128xf32>,
    %c18_i32 = arith.constant 18 : i32
    %277 = vector.broadcast %c18_i32 : i32 to vector<4x128xi32>
    %278 = arith.cmpi eq, %14, %277 : vector<4x128xi32>
    %279 = arith.extui %278 : vector<4x128xi1> to vector<4x128xi32>
    %280 = arith.sitofp %279 : vector<4x128xi32> to vector<4x128xf32>
    %cst_115 = arith.constant dense<0.000000e+00> : vector<128xf32>
    %281 = vector.multi_reduction <add>, %280, %cst_115 [0] : vector<4x128xf32> to vector<128xf32>
    %c18 = arith.constant 18 : index
    %c0_116 = arith.constant 0 : index
    %282 = vector.load %arg3[%c18, %c0_116] : memref<32x128xf32, #tpu.memory_space<vmem>>, vector<1x128xf32>
    %283 = vector.shape_cast %282 : vector<1x128xf32> to vector<128xf32>
    %284 = vector.shape_cast %281 : vector<128xf32> to vector<1x128xf32>
    tpu.vector_store %arg3[%c18, %c0_116], %284 {strides = array<i32>} : memref<32x128xf32, #tpu.memory_space<vmem>>, vector<1x128xf32>,
    %cst_117 = arith.constant 0.000000e+00 : f32
    %285 = vector.broadcast %cst_117 : f32 to vector<4x128xf32>
    %286 = arith.select %278, %24, %285 : vector<4x128xi1>, vector<4x128xf32>
    %cst_118 = arith.constant dense<0.000000e+00> : vector<128xf32>
    %287 = vector.multi_reduction <add>, %286, %cst_118 [0] : vector<4x128xf32> to vector<128xf32>
    %c18_119 = arith.constant 18 : index
    %c0_120 = arith.constant 0 : index
    %288 = vector.load %arg4[%c18_119, %c0_120] : memref<32x128xf32, #tpu.memory_space<vmem>>, vector<1x128xf32>
    %289 = vector.shape_cast %288 : vector<1x128xf32> to vector<128xf32>
    %290 = vector.shape_cast %287 : vector<128xf32> to vector<1x128xf32>
    tpu.vector_store %arg4[%c18_119, %c0_120], %290 {strides = array<i32>} : memref<32x128xf32, #tpu.memory_space<vmem>>, vector<1x128xf32>,
    %c19_i32 = arith.constant 19 : i32
    %291 = vector.broadcast %c19_i32 : i32 to vector<4x128xi32>
    %292 = arith.cmpi eq, %14, %291 : vector<4x128xi32>
    %293 = arith.extui %292 : vector<4x128xi1> to vector<4x128xi32>
    %294 = arith.sitofp %293 : vector<4x128xi32> to vector<4x128xf32>
    %cst_121 = arith.constant dense<0.000000e+00> : vector<128xf32>
    %295 = vector.multi_reduction <add>, %294, %cst_121 [0] : vector<4x128xf32> to vector<128xf32>
    %c19 = arith.constant 19 : index
    %c0_122 = arith.constant 0 : index
    %296 = vector.load %arg3[%c19, %c0_122] : memref<32x128xf32, #tpu.memory_space<vmem>>, vector<1x128xf32>
    %297 = vector.shape_cast %296 : vector<1x128xf32> to vector<128xf32>
    %298 = vector.shape_cast %295 : vector<128xf32> to vector<1x128xf32>
    tpu.vector_store %arg3[%c19, %c0_122], %298 {strides = array<i32>} : memref<32x128xf32, #tpu.memory_space<vmem>>, vector<1x128xf32>,
    %cst_123 = arith.constant 0.000000e+00 : f32
    %299 = vector.broadcast %cst_123 : f32 to vector<4x128xf32>
    %300 = arith.select %292, %24, %299 : vector<4x128xi1>, vector<4x128xf32>
    %cst_124 = arith.constant dense<0.000000e+00> : vector<128xf32>
    %301 = vector.multi_reduction <add>, %300, %cst_124 [0] : vector<4x128xf32> to vector<128xf32>
    %c19_125 = arith.constant 19 : index
    %c0_126 = arith.constant 0 : index
    %302 = vector.load %arg4[%c19_125, %c0_126] : memref<32x128xf32, #tpu.memory_space<vmem>>, vector<1x128xf32>
    %303 = vector.shape_cast %302 : vector<1x128xf32> to vector<128xf32>
    %304 = vector.shape_cast %301 : vector<128xf32> to vector<1x128xf32>
    tpu.vector_store %arg4[%c19_125, %c0_126], %304 {strides = array<i32>} : memref<32x128xf32, #tpu.memory_space<vmem>>, vector<1x128xf32>,
    %c20_i32 = arith.constant 20 : i32
    %305 = vector.broadcast %c20_i32 : i32 to vector<4x128xi32>
    %306 = arith.cmpi eq, %14, %305 : vector<4x128xi32>
    %307 = arith.extui %306 : vector<4x128xi1> to vector<4x128xi32>
    %308 = arith.sitofp %307 : vector<4x128xi32> to vector<4x128xf32>
    %cst_127 = arith.constant dense<0.000000e+00> : vector<128xf32>
    %309 = vector.multi_reduction <add>, %308, %cst_127 [0] : vector<4x128xf32> to vector<128xf32>
    %c20 = arith.constant 20 : index
    %c0_128 = arith.constant 0 : index
    %310 = vector.load %arg3[%c20, %c0_128] : memref<32x128xf32, #tpu.memory_space<vmem>>, vector<1x128xf32>
    %311 = vector.shape_cast %310 : vector<1x128xf32> to vector<128xf32>
    %312 = vector.shape_cast %309 : vector<128xf32> to vector<1x128xf32>
    tpu.vector_store %arg3[%c20, %c0_128], %312 {strides = array<i32>} : memref<32x128xf32, #tpu.memory_space<vmem>>, vector<1x128xf32>,
    %cst_129 = arith.constant 0.000000e+00 : f32
    %313 = vector.broadcast %cst_129 : f32 to vector<4x128xf32>
    %314 = arith.select %306, %24, %313 : vector<4x128xi1>, vector<4x128xf32>
    %cst_130 = arith.constant dense<0.000000e+00> : vector<128xf32>
    %315 = vector.multi_reduction <add>, %314, %cst_130 [0] : vector<4x128xf32> to vector<128xf32>
    %c20_131 = arith.constant 20 : index
    %c0_132 = arith.constant 0 : index
    %316 = vector.load %arg4[%c20_131, %c0_132] : memref<32x128xf32, #tpu.memory_space<vmem>>, vector<1x128xf32>
    %317 = vector.shape_cast %316 : vector<1x128xf32> to vector<128xf32>
    %318 = vector.shape_cast %315 : vector<128xf32> to vector<1x128xf32>
    tpu.vector_store %arg4[%c20_131, %c0_132], %318 {strides = array<i32>} : memref<32x128xf32, #tpu.memory_space<vmem>>, vector<1x128xf32>,
    %c21_i32 = arith.constant 21 : i32
    %319 = vector.broadcast %c21_i32 : i32 to vector<4x128xi32>
    %320 = arith.cmpi eq, %14, %319 : vector<4x128xi32>
    %321 = arith.extui %320 : vector<4x128xi1> to vector<4x128xi32>
    %322 = arith.sitofp %321 : vector<4x128xi32> to vector<4x128xf32>
    %cst_133 = arith.constant dense<0.000000e+00> : vector<128xf32>
    %323 = vector.multi_reduction <add>, %322, %cst_133 [0] : vector<4x128xf32> to vector<128xf32>
    %c21 = arith.constant 21 : index
    %c0_134 = arith.constant 0 : index
    %324 = vector.load %arg3[%c21, %c0_134] : memref<32x128xf32, #tpu.memory_space<vmem>>, vector<1x128xf32>
    %325 = vector.shape_cast %324 : vector<1x128xf32> to vector<128xf32>
    %326 = vector.shape_cast %323 : vector<128xf32> to vector<1x128xf32>
    tpu.vector_store %arg3[%c21, %c0_134], %326 {strides = array<i32>} : memref<32x128xf32, #tpu.memory_space<vmem>>, vector<1x128xf32>,
    %cst_135 = arith.constant 0.000000e+00 : f32
    %327 = vector.broadcast %cst_135 : f32 to vector<4x128xf32>
    %328 = arith.select %320, %24, %327 : vector<4x128xi1>, vector<4x128xf32>
    %cst_136 = arith.constant dense<0.000000e+00> : vector<128xf32>
    %329 = vector.multi_reduction <add>, %328, %cst_136 [0] : vector<4x128xf32> to vector<128xf32>
    %c21_137 = arith.constant 21 : index
    %c0_138 = arith.constant 0 : index
    %330 = vector.load %arg4[%c21_137, %c0_138] : memref<32x128xf32, #tpu.memory_space<vmem>>, vector<1x128xf32>
    %331 = vector.shape_cast %330 : vector<1x128xf32> to vector<128xf32>
    %332 = vector.shape_cast %329 : vector<128xf32> to vector<1x128xf32>
    tpu.vector_store %arg4[%c21_137, %c0_138], %332 {strides = array<i32>} : memref<32x128xf32, #tpu.memory_space<vmem>>, vector<1x128xf32>,
    %c22_i32 = arith.constant 22 : i32
    %333 = vector.broadcast %c22_i32 : i32 to vector<4x128xi32>
    %334 = arith.cmpi eq, %14, %333 : vector<4x128xi32>
    %335 = arith.extui %334 : vector<4x128xi1> to vector<4x128xi32>
    %336 = arith.sitofp %335 : vector<4x128xi32> to vector<4x128xf32>
    %cst_139 = arith.constant dense<0.000000e+00> : vector<128xf32>
    %337 = vector.multi_reduction <add>, %336, %cst_139 [0] : vector<4x128xf32> to vector<128xf32>
    %c22 = arith.constant 22 : index
    %c0_140 = arith.constant 0 : index
    %338 = vector.load %arg3[%c22, %c0_140] : memref<32x128xf32, #tpu.memory_space<vmem>>, vector<1x128xf32>
    %339 = vector.shape_cast %338 : vector<1x128xf32> to vector<128xf32>
    %340 = vector.shape_cast %337 : vector<128xf32> to vector<1x128xf32>
    tpu.vector_store %arg3[%c22, %c0_140], %340 {strides = array<i32>} : memref<32x128xf32, #tpu.memory_space<vmem>>, vector<1x128xf32>,
    %cst_141 = arith.constant 0.000000e+00 : f32
    %341 = vector.broadcast %cst_141 : f32 to vector<4x128xf32>
    %342 = arith.select %334, %24, %341 : vector<4x128xi1>, vector<4x128xf32>
    %cst_142 = arith.constant dense<0.000000e+00> : vector<128xf32>
    %343 = vector.multi_reduction <add>, %342, %cst_142 [0] : vector<4x128xf32> to vector<128xf32>
    %c22_143 = arith.constant 22 : index
    %c0_144 = arith.constant 0 : index
    %344 = vector.load %arg4[%c22_143, %c0_144] : memref<32x128xf32, #tpu.memory_space<vmem>>, vector<1x128xf32>
    %345 = vector.shape_cast %344 : vector<1x128xf32> to vector<128xf32>
    %346 = vector.shape_cast %343 : vector<128xf32> to vector<1x128xf32>
    tpu.vector_store %arg4[%c22_143, %c0_144], %346 {strides = array<i32>} : memref<32x128xf32, #tpu.memory_space<vmem>>, vector<1x128xf32>,
    %c23_i32 = arith.constant 23 : i32
    %347 = vector.broadcast %c23_i32 : i32 to vector<4x128xi32>
    %348 = arith.cmpi eq, %14, %347 : vector<4x128xi32>
    %349 = arith.extui %348 : vector<4x128xi1> to vector<4x128xi32>
    %350 = arith.sitofp %349 : vector<4x128xi32> to vector<4x128xf32>
    %cst_145 = arith.constant dense<0.000000e+00> : vector<128xf32>
    %351 = vector.multi_reduction <add>, %350, %cst_145 [0] : vector<4x128xf32> to vector<128xf32>
    %c23 = arith.constant 23 : index
    %c0_146 = arith.constant 0 : index
    %352 = vector.load %arg3[%c23, %c0_146] : memref<32x128xf32, #tpu.memory_space<vmem>>, vector<1x128xf32>
    %353 = vector.shape_cast %352 : vector<1x128xf32> to vector<128xf32>
    %354 = vector.shape_cast %351 : vector<128xf32> to vector<1x128xf32>
    tpu.vector_store %arg3[%c23, %c0_146], %354 {strides = array<i32>} : memref<32x128xf32, #tpu.memory_space<vmem>>, vector<1x128xf32>,
    %cst_147 = arith.constant 0.000000e+00 : f32
    %355 = vector.broadcast %cst_147 : f32 to vector<4x128xf32>
    %356 = arith.select %348, %24, %355 : vector<4x128xi1>, vector<4x128xf32>
    %cst_148 = arith.constant dense<0.000000e+00> : vector<128xf32>
    %357 = vector.multi_reduction <add>, %356, %cst_148 [0] : vector<4x128xf32> to vector<128xf32>
    %c23_149 = arith.constant 23 : index
    %c0_150 = arith.constant 0 : index
    %358 = vector.load %arg4[%c23_149, %c0_150] : memref<32x128xf32, #tpu.memory_space<vmem>>, vector<1x128xf32>
    %359 = vector.shape_cast %358 : vector<1x128xf32> to vector<128xf32>
    %360 = vector.shape_cast %357 : vector<128xf32> to vector<1x128xf32>
    tpu.vector_store %arg4[%c23_149, %c0_150], %360 {strides = array<i32>} : memref<32x128xf32, #tpu.memory_space<vmem>>, vector<1x128xf32>,
    %c24_i32 = arith.constant 24 : i32
    %361 = vector.broadcast %c24_i32 : i32 to vector<4x128xi32>
    %362 = arith.cmpi eq, %14, %361 : vector<4x128xi32>
    %363 = arith.extui %362 : vector<4x128xi1> to vector<4x128xi32>
    %364 = arith.sitofp %363 : vector<4x128xi32> to vector<4x128xf32>
    %cst_151 = arith.constant dense<0.000000e+00> : vector<128xf32>
    %365 = vector.multi_reduction <add>, %364, %cst_151 [0] : vector<4x128xf32> to vector<128xf32>
    %c24 = arith.constant 24 : index
    %c0_152 = arith.constant 0 : index
    %366 = vector.load %arg3[%c24, %c0_152] : memref<32x128xf32, #tpu.memory_space<vmem>>, vector<1x128xf32>
    %367 = vector.shape_cast %366 : vector<1x128xf32> to vector<128xf32>
    %368 = vector.shape_cast %365 : vector<128xf32> to vector<1x128xf32>
    tpu.vector_store %arg3[%c24, %c0_152], %368 {strides = array<i32>} : memref<32x128xf32, #tpu.memory_space<vmem>>, vector<1x128xf32>,
    %cst_153 = arith.constant 0.000000e+00 : f32
    %369 = vector.broadcast %cst_153 : f32 to vector<4x128xf32>
    %370 = arith.select %362, %24, %369 : vector<4x128xi1>, vector<4x128xf32>
    %cst_154 = arith.constant dense<0.000000e+00> : vector<128xf32>
    %371 = vector.multi_reduction <add>, %370, %cst_154 [0] : vector<4x128xf32> to vector<128xf32>
    %c24_155 = arith.constant 24 : index
    %c0_156 = arith.constant 0 : index
    %372 = vector.load %arg4[%c24_155, %c0_156] : memref<32x128xf32, #tpu.memory_space<vmem>>, vector<1x128xf32>
    %373 = vector.shape_cast %372 : vector<1x128xf32> to vector<128xf32>
    %374 = vector.shape_cast %371 : vector<128xf32> to vector<1x128xf32>
    tpu.vector_store %arg4[%c24_155, %c0_156], %374 {strides = array<i32>} : memref<32x128xf32, #tpu.memory_space<vmem>>, vector<1x128xf32>,
    %c25_i32 = arith.constant 25 : i32
    %375 = vector.broadcast %c25_i32 : i32 to vector<4x128xi32>
    %376 = arith.cmpi eq, %14, %375 : vector<4x128xi32>
    %377 = arith.extui %376 : vector<4x128xi1> to vector<4x128xi32>
    %378 = arith.sitofp %377 : vector<4x128xi32> to vector<4x128xf32>
    %cst_157 = arith.constant dense<0.000000e+00> : vector<128xf32>
    %379 = vector.multi_reduction <add>, %378, %cst_157 [0] : vector<4x128xf32> to vector<128xf32>
    %c25 = arith.constant 25 : index
    %c0_158 = arith.constant 0 : index
    %380 = vector.load %arg3[%c25, %c0_158] : memref<32x128xf32, #tpu.memory_space<vmem>>, vector<1x128xf32>
    %381 = vector.shape_cast %380 : vector<1x128xf32> to vector<128xf32>
    %382 = vector.shape_cast %379 : vector<128xf32> to vector<1x128xf32>
    tpu.vector_store %arg3[%c25, %c0_158], %382 {strides = array<i32>} : memref<32x128xf32, #tpu.memory_space<vmem>>, vector<1x128xf32>,
    %cst_159 = arith.constant 0.000000e+00 : f32
    %383 = vector.broadcast %cst_159 : f32 to vector<4x128xf32>
    %384 = arith.select %376, %24, %383 : vector<4x128xi1>, vector<4x128xf32>
    %cst_160 = arith.constant dense<0.000000e+00> : vector<128xf32>
    %385 = vector.multi_reduction <add>, %384, %cst_160 [0] : vector<4x128xf32> to vector<128xf32>
    %c25_161 = arith.constant 25 : index
    %c0_162 = arith.constant 0 : index
    %386 = vector.load %arg4[%c25_161, %c0_162] : memref<32x128xf32, #tpu.memory_space<vmem>>, vector<1x128xf32>
    %387 = vector.shape_cast %386 : vector<1x128xf32> to vector<128xf32>
    %388 = vector.shape_cast %385 : vector<128xf32> to vector<1x128xf32>
    tpu.vector_store %arg4[%c25_161, %c0_162], %388 {strides = array<i32>} : memref<32x128xf32, #tpu.memory_space<vmem>>, vector<1x128xf32>,
    %c26_i32 = arith.constant 26 : i32
    %389 = vector.broadcast %c26_i32 : i32 to vector<4x128xi32>
    %390 = arith.cmpi eq, %14, %389 : vector<4x128xi32>
    %391 = arith.extui %390 : vector<4x128xi1> to vector<4x128xi32>
    %392 = arith.sitofp %391 : vector<4x128xi32> to vector<4x128xf32>
    %cst_163 = arith.constant dense<0.000000e+00> : vector<128xf32>
    %393 = vector.multi_reduction <add>, %392, %cst_163 [0] : vector<4x128xf32> to vector<128xf32>
    %c26 = arith.constant 26 : index
    %c0_164 = arith.constant 0 : index
    %394 = vector.load %arg3[%c26, %c0_164] : memref<32x128xf32, #tpu.memory_space<vmem>>, vector<1x128xf32>
    %395 = vector.shape_cast %394 : vector<1x128xf32> to vector<128xf32>
    %396 = vector.shape_cast %393 : vector<128xf32> to vector<1x128xf32>
    tpu.vector_store %arg3[%c26, %c0_164], %396 {strides = array<i32>} : memref<32x128xf32, #tpu.memory_space<vmem>>, vector<1x128xf32>,
    %cst_165 = arith.constant 0.000000e+00 : f32
    %397 = vector.broadcast %cst_165 : f32 to vector<4x128xf32>
    %398 = arith.select %390, %24, %397 : vector<4x128xi1>, vector<4x128xf32>
    %cst_166 = arith.constant dense<0.000000e+00> : vector<128xf32>
    %399 = vector.multi_reduction <add>, %398, %cst_166 [0] : vector<4x128xf32> to vector<128xf32>
    %c26_167 = arith.constant 26 : index
    %c0_168 = arith.constant 0 : index
    %400 = vector.load %arg4[%c26_167, %c0_168] : memref<32x128xf32, #tpu.memory_space<vmem>>, vector<1x128xf32>
    %401 = vector.shape_cast %400 : vector<1x128xf32> to vector<128xf32>
    %402 = vector.shape_cast %399 : vector<128xf32> to vector<1x128xf32>
    tpu.vector_store %arg4[%c26_167, %c0_168], %402 {strides = array<i32>} : memref<32x128xf32, #tpu.memory_space<vmem>>, vector<1x128xf32>,
    %c27_i32 = arith.constant 27 : i32
    %403 = vector.broadcast %c27_i32 : i32 to vector<4x128xi32>
    %404 = arith.cmpi eq, %14, %403 : vector<4x128xi32>
    %405 = arith.extui %404 : vector<4x128xi1> to vector<4x128xi32>
    %406 = arith.sitofp %405 : vector<4x128xi32> to vector<4x128xf32>
    %cst_169 = arith.constant dense<0.000000e+00> : vector<128xf32>
    %407 = vector.multi_reduction <add>, %406, %cst_169 [0] : vector<4x128xf32> to vector<128xf32>
    %c27 = arith.constant 27 : index
    %c0_170 = arith.constant 0 : index
    %408 = vector.load %arg3[%c27, %c0_170] : memref<32x128xf32, #tpu.memory_space<vmem>>, vector<1x128xf32>
    %409 = vector.shape_cast %408 : vector<1x128xf32> to vector<128xf32>
    %410 = vector.shape_cast %407 : vector<128xf32> to vector<1x128xf32>
    tpu.vector_store %arg3[%c27, %c0_170], %410 {strides = array<i32>} : memref<32x128xf32, #tpu.memory_space<vmem>>, vector<1x128xf32>,
    %cst_171 = arith.constant 0.000000e+00 : f32
    %411 = vector.broadcast %cst_171 : f32 to vector<4x128xf32>
    %412 = arith.select %404, %24, %411 : vector<4x128xi1>, vector<4x128xf32>
    %cst_172 = arith.constant dense<0.000000e+00> : vector<128xf32>
    %413 = vector.multi_reduction <add>, %412, %cst_172 [0] : vector<4x128xf32> to vector<128xf32>
    %c27_173 = arith.constant 27 : index
    %c0_174 = arith.constant 0 : index
    %414 = vector.load %arg4[%c27_173, %c0_174] : memref<32x128xf32, #tpu.memory_space<vmem>>, vector<1x128xf32>
    %415 = vector.shape_cast %414 : vector<1x128xf32> to vector<128xf32>
    %416 = vector.shape_cast %413 : vector<128xf32> to vector<1x128xf32>
    tpu.vector_store %arg4[%c27_173, %c0_174], %416 {strides = array<i32>} : memref<32x128xf32, #tpu.memory_space<vmem>>, vector<1x128xf32>,
    %c28_i32 = arith.constant 28 : i32
    %417 = vector.broadcast %c28_i32 : i32 to vector<4x128xi32>
    %418 = arith.cmpi eq, %14, %417 : vector<4x128xi32>
    %419 = arith.extui %418 : vector<4x128xi1> to vector<4x128xi32>
    %420 = arith.sitofp %419 : vector<4x128xi32> to vector<4x128xf32>
    %cst_175 = arith.constant dense<0.000000e+00> : vector<128xf32>
    %421 = vector.multi_reduction <add>, %420, %cst_175 [0] : vector<4x128xf32> to vector<128xf32>
    %c28 = arith.constant 28 : index
    %c0_176 = arith.constant 0 : index
    %422 = vector.load %arg3[%c28, %c0_176] : memref<32x128xf32, #tpu.memory_space<vmem>>, vector<1x128xf32>
    %423 = vector.shape_cast %422 : vector<1x128xf32> to vector<128xf32>
    %424 = vector.shape_cast %421 : vector<128xf32> to vector<1x128xf32>
    tpu.vector_store %arg3[%c28, %c0_176], %424 {strides = array<i32>} : memref<32x128xf32, #tpu.memory_space<vmem>>, vector<1x128xf32>,
    %cst_177 = arith.constant 0.000000e+00 : f32
    %425 = vector.broadcast %cst_177 : f32 to vector<4x128xf32>
    %426 = arith.select %418, %24, %425 : vector<4x128xi1>, vector<4x128xf32>
    %cst_178 = arith.constant dense<0.000000e+00> : vector<128xf32>
    %427 = vector.multi_reduction <add>, %426, %cst_178 [0] : vector<4x128xf32> to vector<128xf32>
    %c28_179 = arith.constant 28 : index
    %c0_180 = arith.constant 0 : index
    %428 = vector.load %arg4[%c28_179, %c0_180] : memref<32x128xf32, #tpu.memory_space<vmem>>, vector<1x128xf32>
    %429 = vector.shape_cast %428 : vector<1x128xf32> to vector<128xf32>
    %430 = vector.shape_cast %427 : vector<128xf32> to vector<1x128xf32>
    tpu.vector_store %arg4[%c28_179, %c0_180], %430 {strides = array<i32>} : memref<32x128xf32, #tpu.memory_space<vmem>>, vector<1x128xf32>,
    %c29_i32_181 = arith.constant 29 : i32
    %431 = vector.broadcast %c29_i32_181 : i32 to vector<4x128xi32>
    %432 = arith.cmpi eq, %14, %431 : vector<4x128xi32>
    %433 = arith.extui %432 : vector<4x128xi1> to vector<4x128xi32>
    %434 = arith.sitofp %433 : vector<4x128xi32> to vector<4x128xf32>
    %cst_182 = arith.constant dense<0.000000e+00> : vector<128xf32>
    %435 = vector.multi_reduction <add>, %434, %cst_182 [0] : vector<4x128xf32> to vector<128xf32>
    %c29 = arith.constant 29 : index
    %c0_183 = arith.constant 0 : index
    %436 = vector.load %arg3[%c29, %c0_183] : memref<32x128xf32, #tpu.memory_space<vmem>>, vector<1x128xf32>
    %437 = vector.shape_cast %436 : vector<1x128xf32> to vector<128xf32>
    %438 = vector.shape_cast %435 : vector<128xf32> to vector<1x128xf32>
    tpu.vector_store %arg3[%c29, %c0_183], %438 {strides = array<i32>} : memref<32x128xf32, #tpu.memory_space<vmem>>, vector<1x128xf32>,
    %cst_184 = arith.constant 0.000000e+00 : f32
    %439 = vector.broadcast %cst_184 : f32 to vector<4x128xf32>
    %440 = arith.select %432, %24, %439 : vector<4x128xi1>, vector<4x128xf32>
    %cst_185 = arith.constant dense<0.000000e+00> : vector<128xf32>
    %441 = vector.multi_reduction <add>, %440, %cst_185 [0] : vector<4x128xf32> to vector<128xf32>
    %c29_186 = arith.constant 29 : index
    %c0_187 = arith.constant 0 : index
    %442 = vector.load %arg4[%c29_186, %c0_187] : memref<32x128xf32, #tpu.memory_space<vmem>>, vector<1x128xf32>
    %443 = vector.shape_cast %442 : vector<1x128xf32> to vector<128xf32>
    %444 = vector.shape_cast %441 : vector<128xf32> to vector<1x128xf32>
    tpu.vector_store %arg4[%c29_186, %c0_187], %444 {strides = array<i32>} : memref<32x128xf32, #tpu.memory_space<vmem>>, vector<1x128xf32>,
    %cst_188 = arith.constant 0.000000e+00 : f32
    %445 = vector.broadcast %cst_188 : f32 to vector<128xf32>
    %c30 = arith.constant 30 : index
    %c0_189 = arith.constant 0 : index
    %446 = vector.load %arg3[%c30, %c0_189] : memref<32x128xf32, #tpu.memory_space<vmem>>, vector<1x128xf32>
    %447 = vector.shape_cast %446 : vector<1x128xf32> to vector<128xf32>
    %448 = vector.shape_cast %445 : vector<128xf32> to vector<1x128xf32>
    tpu.vector_store %arg3[%c30, %c0_189], %448 {strides = array<i32>} : memref<32x128xf32, #tpu.memory_space<vmem>>, vector<1x128xf32>,
    %c30_190 = arith.constant 30 : index
    %c0_191 = arith.constant 0 : index
    %449 = vector.load %arg4[%c30_190, %c0_191] : memref<32x128xf32, #tpu.memory_space<vmem>>, vector<1x128xf32>
    %450 = vector.shape_cast %449 : vector<1x128xf32> to vector<128xf32>
    %451 = vector.shape_cast %445 : vector<128xf32> to vector<1x128xf32>
    tpu.vector_store %arg4[%c30_190, %c0_191], %451 {strides = array<i32>} : memref<32x128xf32, #tpu.memory_space<vmem>>, vector<1x128xf32>,
    %c31 = arith.constant 31 : index
    %c0_192 = arith.constant 0 : index
    %452 = vector.load %arg3[%c31, %c0_192] : memref<32x128xf32, #tpu.memory_space<vmem>>, vector<1x128xf32>
    %453 = vector.shape_cast %452 : vector<1x128xf32> to vector<128xf32>
    %454 = vector.shape_cast %445 : vector<128xf32> to vector<1x128xf32>
    tpu.vector_store %arg3[%c31, %c0_192], %454 {strides = array<i32>} : memref<32x128xf32, #tpu.memory_space<vmem>>, vector<1x128xf32>,
    %c31_193 = arith.constant 31 : index
    %c0_194 = arith.constant 0 : index
    %455 = vector.load %arg4[%c31_193, %c0_194] : memref<32x128xf32, #tpu.memory_space<vmem>>, vector<1x128xf32>
    %456 = vector.shape_cast %455 : vector<1x128xf32> to vector<128xf32>
    %457 = vector.shape_cast %445 : vector<128xf32> to vector<1x128xf32>
    tpu.vector_store %arg4[%c31_193, %c0_194], %457 {strides = array<i32>} : memref<32x128xf32, #tpu.memory_space<vmem>>, vector<1x128xf32>,
    return
  }
  func.func @transform_0(%arg0: i32) -> (i32, i32) {
    %c0_i32 = arith.constant 0 : i32
    %c0_i32_0 = arith.constant 0 : i32
    return %arg0, %c0_i32 : i32, i32
  }
  func.func @transform_1(%arg0: i32) -> (i32, i32) {
    %c0_i32 = arith.constant 0 : i32
    %c0_i32_0 = arith.constant 0 : i32
    return %arg0, %c0_i32 : i32, i32
  }
  func.func @transform_2(%arg0: i32) -> (i32, i32) {
    %c0_i32 = arith.constant 0 : i32
    %c0_i32_0 = arith.constant 0 : i32
    return %c0_i32, %arg0 : i32, i32
  }
  func.func @transform_3(%arg0: i32) -> (i32, i32) {
    %c0_i32 = arith.constant 0 : i32
    %c0_i32_0 = arith.constant 0 : i32
    return %c0_i32, %arg0 : i32, i32
  }
}

</mosaic_0001>

<bundles_post_ra>
// kernel: tpu_custom_call.1
= control target key start
LH: loop header
LB: loop body
LE: loop exit
PB: predicated region body
PF: predicated region fallthrough
CT: control target
= control target key end

     0   :  { %9 = vsyncpa [#allocation3], 0  ;;  %s1132_s0 = inlined_call_operand.hbm [shape: f32[4,128], index: 0, kind: input, shape index: {}]   ;;  %s1133_s1 = inlined_call_operand.hbm [shape: f32[4,128], index: 1, kind: input, shape index: {}]   ;;  %s1134_s2 = inlined_call_operand.hbm [shape: f32[32,128], index: 2, kind: output, shape index: {0}]   ;;  %s1135_s3 = inlined_call_operand.hbm [shape: f32[32,128], index: 3, kind: output, shape index: {1}]  }
   0x1   :  { %10 = vsyncpa [#allocation6], 0 }
   0x2   :  { %11 = vsyncpa [#allocation4], 0 }
   0x3   :  { %12 = vsyncpa [#allocation9], 0  ;;  %s18_s14 = sshll.u32 %s1132_s0, 4  ;;  %s883_s15 = smov [#allocation2]   ;;  %s19_s14 = int_to_ptr.hbm [resolvable:$true] %s18_s14 }
   0x4   :  { %s20_s16 = sshll.u32 %s883_s15, 4  ;;  %s29_s19 = sshll.u32 %s1133_s1, 4  ;;  %s21_s16 = int_to_ptr.vmem [resolvable:$true] %s20_s16  ;;  %s30_s19 = int_to_ptr.hbm [resolvable:$true] %s29_s19 }
   0x5   :  { %23 = dma.hbm_to_vmem [thread:$0]  %s19_s14, 64, %s21_s16, [#allocation3]  }
   0x6   :  { %s884_s20 = smov [#allocation5]  }
   0x7   :  { %s31_s21 = sshll.u32 %s884_s20, 4  ;;  %s32_s21 = int_to_ptr.vmem [resolvable:$true] %s31_s21 }
   0x8   :  { %34 = dma.hbm_to_vmem [thread:$0]  %s30_s19, 64, %s32_s21, [#allocation6]  }
   0x9   :  { %875 = dma.done.wait [#allocation3], 64  }
   0xa   :  { %876 = vsyncadd [#allocation3], 4294967232 }
   0xb   :  { %877 = dma.done.wait [#allocation6], 64  }
   0xc   :  { %878 = vsyncadd [#allocation6], 4294967232  ;;  %v43_v0 = vld [vmem:[#allocation2] sm:$0xf]  ;;  %v885_v7 = vmov 0.0   ;;  %vm91_vm6 = vcmask 1043456  }
   0xd   :  { %v731_v1 = vmul.f32 -1.442695, %v43_v0  ;;  %v74_v2 = vand.u32 2147483647, %v43_v0  ;;  %689 = vst [vmem:[#allocation7 + $0x1e] sm:$0x1] %v885_v7 }
   0xe   :  { %690 = vst [vmem:[#allocation8 + $0x1e] sm:$0x1] %v885_v7  ;;  %v44_v19 = vld [vmem:[#allocation5] sm:$0xf]  ;;  %v71_v26 = vmax.f32 %v43_v0, 0.0  ;;  %s886_s0 = smov [#allocation7]  }
   0xf   :  { %771 = vpow2.f32 %v731_v1  ;;  %v75_v3 = vsub.f32 0.0, %v74_v2  ;;  %691 = vst [vmem:[#allocation7 + $0x1f] sm:$0x1] %v885_v7  ;;  %v72_v27 = vmul.f32 %v44_v19, %v43_v0  ;;  %s697_s1 = sshll.u32 %s886_s0, 4  ;;  %s699_s24 = sshll.u32 %s1134_s2, 4  ;;  %s698_s1 = int_to_ptr.vmem [resolvable:$true] %s697_s1  ;;  %s700_s24 = int_to_ptr.hbm [resolvable:$true] %s699_s24 }
  0x10   :  { %692 = vst [vmem:[#allocation8 + $0x1f] sm:$0x1] %v885_v7  ;;  %s887_s25 = smov [#allocation8]   ;;  %s712_s29 = sshll.u32 %s1135_s3, 4  ;;  %s713_s29 = int_to_ptr.hbm [resolvable:$true] %s712_s29 }
  0x11   :  { %v76_v4 = vmul.f32 1.442695, %v75_v3  ;;  %v73_v32 = vsub.f32 %v71_v26, %v72_v27  ;;  %s710_s26 = sshll.u32 %s887_s25, 4  ;;  %s888_s30 = smov 128   ;;  %s711_s26 = int_to_ptr.vmem [resolvable:$true] %s710_s26 }
  0x12   :  { %s889_s2 = smov 8  }
  0x13   :  { %773 = vpow2.f32 %v76_v4 }
  0x15   :  { %v772_v5 = vpop.eup %771 }
  0x16   :  { %v48_v6 = vadd.f32 1.0, %v772_v5 }
  0x18   :  { %775 = vrcp.f32 %v48_v6  ;;  %v60_v12 = vand.u32 2147483648, %v48_v6  ;;  %vm54_vm0 = vweird.f32 %v48_v6  ;;  %v58_v14 = vand.u32 2147483647, %v48_v6 }
  0x19   :  { %v774_v8 = vpop.eup %773 }
  0x1a   :  { %v78_v10 = vadd.f32 1.0, %v774_v8  ;;  %v81_v16 = vmul.f32 -0.5, %v774_v8  ;;  %v61_v17 = vor.u32 1.1754944e-38, %v60_v12  ;;  %vm59_vm3 = vcmp.eq.f32.partialorder %v58_v14, 8.507059e+37 }
  0x1b   :  { %v84_v24 = vand.u32 2147483647, %v774_v8 }
  0x1c   :  { %777 = vlog2.f32 %v78_v10  ;;  %v82_v21 = vadd.f32 1.0, %v81_v16 }
  0x1d   :  { %vm85_vm4 = vcmp.lt.f32.partialorder %v84_v24, 0.0004427343 }
  0x1e   :  { %v776_v9 = vpop.eup %775  ;;  %v83_v30 = vmul.f32 %v774_v8, %v82_v21 }
  0x1f   :  { %v50_v11 = vmul.f32 %v776_v9, %v48_v6  ;;  %vm55_vm1 = vweird.f32 %v776_v9 }
  0x20   :  { %vm56_vm2 = vmor %vm54_vm0, %vm55_vm1 }
  0x21   :  { %v51_v13 = vsub.f32 1.0, %v50_v11 }
  0x22   :  { %v778_v22 = vpop.eup %777 }
  0x23   :  { %v52_v15 = vmul.f32 %v776_v9, %v51_v13  ;;  %v80_v29 = vmul.f32 0.6931472, %v778_v22 }
  0x25   :  { %v53_v18 = vadd.f32 %v776_v9, %v52_v15  ;;  %v86_v34 = vsel %vm85_vm4, %v83_v30, %v80_v29 }
  0x26   :  { %v920_v36 = vadd.f32 %v86_v34, %v73_v32 }
  0x27   :  { %v57_v20 = vsel %vm56_vm2, %v776_v9, %v53_v18 }
  0x28   :  { %v62_v23 = vsel %vm59_vm3, %v61_v17, %v57_v20 }
  0x29   :  { %v64_v25 = vsub.f32 %v62_v23, %v44_v19 }
  0x2b   :  { %v65_v28 = vand.u32 2147483647, %v64_v25 }
  0x2d   :  { %v66_v31 = vmul.f32 30.0, %v65_v28 }
  0x2f   :  { %v67_v33 = vfloor.f32 %v66_v31 }
  0x31   :  { %v763_v35 = vcvt.f32.s32 %v67_v33 }
  0x33   :  { %vm69_vm5 = vcmp.lt.s32.totalorder %v763_v35, 29 }
  0x34   :  { %v922_v37 = vsel %vm69_vm5, %v763_v35, 29 }
  0x35   :  { %vm88_vm7 = vcmp.eq.s32.totalorder %v922_v37, 0  ;;  %vm109_vm8 = vcmp.eq.s32.totalorder %v922_v37, 1  ;;  %vm129_vm9 = vcmp.eq.s32.totalorder %v922_v37, 2  ;;  %vm149_vm10 = vcmp.eq.s32.totalorder %v922_v37, 3 }
  0x36   :  { %v732_v38 = vsel %vm88_vm7, 1.0, %v885_v7  ;;  %v100_v39 = vsel %vm88_vm7, %v920_v36, 0.0  ;;  %v733_v40 = vsel %vm109_vm8, 1.0, %v885_v7  ;;  %v120_v41 = vsel %vm109_vm8, %v920_v36, 0.0 }
  0x37   :  { %v92_v42 = vsel %vm91_vm6, %v732_v38, 0.0  ;;  %v101_v43 = vsel %vm91_vm6, %v100_v39, 0.0  ;;  %v112_v44 = vsel %vm91_vm6, %v733_v40, 0.0  ;;  %v121_v45 = vsel %vm91_vm6, %v120_v41, 0.0 }
  0x38   :  { %v93_v46 = vrot.slane %v92_v42, 4  ;;  %v102_v47 = vrot.slane %v101_v43, 4  ;;  %v113_v48 = vrot.slane %v112_v44, 4  ;;  %v122_v49 = vrot.slane %v121_v45, 4 }
  0x39   :  { %v734_v50 = vsel %vm129_vm9, 1.0, %v885_v7  ;;  %v140_v51 = vsel %vm129_vm9, %v920_v36, 0.0  ;;  %v735_v52 = vsel %vm149_vm10, 1.0, %v885_v7  ;;  %v160_v53 = vsel %vm149_vm10, %v920_v36, 0.0 }
  0x3a   :  { %v94_v54 = vadd.f32 %v93_v46, %v92_v42  ;;  %v103_v55 = vadd.f32 %v102_v47, %v101_v43  ;;  %v114_v56 = vadd.f32 %v113_v48, %v112_v44  ;;  %v123_v57 = vadd.f32 %v122_v49, %v121_v45 }
  0x3b   :  { %v132_v58 = vsel %vm91_vm6, %v734_v50, 0.0  ;;  %v141_v59 = vsel %vm91_vm6, %v140_v51, 0.0  ;;  %v152_v60 = vsel %vm91_vm6, %v735_v52, 0.0  ;;  %v161_v61 = vsel %vm91_vm6, %v160_v53, 0.0 }
  0x3c   :  { %v95_v62 = vrot.slane %v94_v54, 2  ;;  %v104_v63 = vrot.slane %v103_v55, 2  ;;  %v115_v0 = vrot.slane %v114_v56, 2  ;;  %v124_v1 = vrot.slane %v123_v57, 2 }
  0x3d   :  { %v133_v2 = vrot.slane %v132_v58, 4  ;;  %v142_v3 = vrot.slane %v141_v59, 4  ;;  %v153_v4 = vrot.slane %v152_v60, 4  ;;  %v162_v5 = vrot.slane %v161_v61, 4 }
  0x3e   :  { %v96_v6 = vadd.f32 %v95_v62, %v94_v54  ;;  %v105_v8 = vadd.f32 %v104_v63, %v103_v55  ;;  %v116_v9 = vadd.f32 %v115_v0, %v114_v56  ;;  %v125_v10 = vadd.f32 %v124_v1, %v123_v57 }
  0x3f   :  { %v134_v11 = vadd.f32 %v133_v2, %v132_v58  ;;  %v143_v12 = vadd.f32 %v142_v3, %v141_v59  ;;  %v154_v13 = vadd.f32 %v153_v4, %v152_v60  ;;  %v163_v14 = vadd.f32 %v162_v5, %v161_v61 }
  0x40   :  { %v97_v15 = vrot.slane %v96_v6, 1  ;;  %v106_v16 = vrot.slane %v105_v8, 1  ;;  %v117_v17 = vrot.slane %v116_v9, 1  ;;  %v126_v18 = vrot.slane %v125_v10, 1 }
  0x41   :  { %v135_v19 = vrot.slane %v134_v11, 2  ;;  %v144_v20 = vrot.slane %v143_v12, 2  ;;  %v155_v21 = vrot.slane %v154_v13, 2  ;;  %v164_v22 = vrot.slane %v163_v14, 2 }
  0x42   :  { %v98_v23 = vadd.f32 %v97_v15, %v96_v6  ;;  %v107_v24 = vadd.f32 %v106_v16, %v105_v8  ;;  %v118_v25 = vadd.f32 %v117_v17, %v116_v9  ;;  %v127_v26 = vadd.f32 %v126_v18, %v125_v10 }
  0x43   :  { %v136_v27 = vadd.f32 %v135_v19, %v134_v11  ;;  %v145_v28 = vadd.f32 %v144_v20, %v143_v12  ;;  %v156_v29 = vadd.f32 %v155_v21, %v154_v13  ;;  %v165_v30 = vadd.f32 %v164_v22, %v163_v14 }
  0x44   :  { %99 = vst [vmem:[#allocation7] sm:$0x1] %v98_v23  ;;  %vm169_vm11 = vcmp.eq.s32.totalorder %v922_v37, 4  ;;  %vm189_vm12 = vcmp.eq.s32.totalorder %v922_v37, 5  ;;  %vm209_vm13 = vcmp.eq.s32.totalorder %v922_v37, 6  ;;  %vm229_vm14 = vcmp.eq.s32.totalorder %v922_v37, 7 }
  0x45   :  { %108 = vst [vmem:[#allocation8] sm:$0x1] %v107_v24  ;;  %v137_v31 = vrot.slane %v136_v27, 1  ;;  %v146_v32 = vrot.slane %v145_v28, 1  ;;  %v157_v33 = vrot.slane %v156_v29, 1  ;;  %v166_v34 = vrot.slane %v165_v30, 1 }
  0x46   :  { %119 = vst [vmem:[#allocation7 + $0x1] sm:$0x1] %v118_v25  ;;  %v736_v35 = vsel %vm169_vm11, 1.0, %v885_v7  ;;  %v180_v38 = vsel %vm169_vm11, %v920_v36, 0.0  ;;  %v737_v39 = vsel %vm189_vm12, 1.0, %v885_v7  ;;  %v200_v40 = vsel %vm189_vm12, %v920_v36, 0.0 }
  0x47   :  { %128 = vst [vmem:[#allocation8 + $0x1] sm:$0x1] %v127_v26  ;;  %v138_v41 = vadd.f32 %v137_v31, %v136_v27  ;;  %v147_v42 = vadd.f32 %v146_v32, %v145_v28  ;;  %v158_v43 = vadd.f32 %v157_v33, %v156_v29  ;;  %v167_v44 = vadd.f32 %v166_v34, %v165_v30 }
  0x48   :  { %v172_v45 = vsel %vm91_vm6, %v736_v35, 0.0  ;;  %v181_v46 = vsel %vm91_vm6, %v180_v38, 0.0  ;;  %v192_v47 = vsel %vm91_vm6, %v737_v39, 0.0  ;;  %v201_v48 = vsel %vm91_vm6, %v200_v40, 0.0 }
  0x49   :  { %139 = vst [vmem:[#allocation7 + $0x2] sm:$0x1] %v138_v41  ;;  %v173_v49 = vrot.slane %v172_v45, 4  ;;  %v182_v50 = vrot.slane %v181_v46, 4  ;;  %v193_v51 = vrot.slane %v192_v47, 4  ;;  %v202_v52 = vrot.slane %v201_v48, 4 }
  0x4a   :  { %148 = vst [vmem:[#allocation8 + $0x2] sm:$0x1] %v147_v42  ;;  %v738_v53 = vsel %vm209_vm13, 1.0, %v885_v7  ;;  %v220_v54 = vsel %vm209_vm13, %v920_v36, 0.0  ;;  %v739_v55 = vsel %vm229_vm14, 1.0, %v885_v7  ;;  %v240_v56 = vsel %vm229_vm14, %v920_v36, 0.0 }
  0x4b   :  { %159 = vst [vmem:[#allocation7 + $0x3] sm:$0x1] %v158_v43  ;;  %v174_v57 = vadd.f32 %v173_v49, %v172_v45  ;;  %v183_v58 = vadd.f32 %v182_v50, %v181_v46  ;;  %v194_v59 = vadd.f32 %v193_v51, %v192_v47  ;;  %v203_v60 = vadd.f32 %v202_v52, %v201_v48 }
  0x4c   :  { %168 = vst [vmem:[#allocation8 + $0x3] sm:$0x1] %v167_v44  ;;  %v212_v61 = vsel %vm91_vm6, %v738_v53, 0.0  ;;  %v221_v62 = vsel %vm91_vm6, %v220_v54, 0.0  ;;  %v232_v63 = vsel %vm91_vm6, %v739_v55, 0.0  ;;  %v241_v0 = vsel %vm91_vm6, %v240_v56, 0.0 }
  0x4d   :  { %v175_v1 = vrot.slane %v174_v57, 2  ;;  %v184_v2 = vrot.slane %v183_v58, 2  ;;  %v195_v3 = vrot.slane %v194_v59, 2  ;;  %v204_v4 = vrot.slane %v203_v60, 2 }
  0x4e   :  { %v213_v5 = vrot.slane %v212_v61, 4  ;;  %v222_v6 = vrot.slane %v221_v62, 4  ;;  %v233_v8 = vrot.slane %v232_v63, 4  ;;  %v242_v9 = vrot.slane %v241_v0, 4 }
  0x4f   :  { %v176_v10 = vadd.f32 %v175_v1, %v174_v57  ;;  %v185_v11 = vadd.f32 %v184_v2, %v183_v58  ;;  %v196_v12 = vadd.f32 %v195_v3, %v194_v59  ;;  %v205_v13 = vadd.f32 %v204_v4, %v203_v60 }
  0x50   :  { %v214_v14 = vadd.f32 %v213_v5, %v212_v61  ;;  %v223_v15 = vadd.f32 %v222_v6, %v221_v62  ;;  %v234_v16 = vadd.f32 %v233_v8, %v232_v63  ;;  %v243_v17 = vadd.f32 %v242_v9, %v241_v0 }
  0x51   :  { %v177_v18 = vrot.slane %v176_v10, 1  ;;  %v186_v19 = vrot.slane %v185_v11, 1  ;;  %v197_v20 = vrot.slane %v196_v12, 1  ;;  %v206_v21 = vrot.slane %v205_v13, 1 }
  0x52   :  { %v215_v22 = vrot.slane %v214_v14, 2  ;;  %v224_v23 = vrot.slane %v223_v15, 2  ;;  %v235_v24 = vrot.slane %v234_v16, 2  ;;  %v244_v25 = vrot.slane %v243_v17, 2 }
  0x53   :  { %v178_v26 = vadd.f32 %v177_v18, %v176_v10  ;;  %v187_v27 = vadd.f32 %v186_v19, %v185_v11  ;;  %v198_v28 = vadd.f32 %v197_v20, %v196_v12  ;;  %v207_v29 = vadd.f32 %v206_v21, %v205_v13 }
  0x54   :  { %v216_v30 = vadd.f32 %v215_v22, %v214_v14  ;;  %v225_v31 = vadd.f32 %v224_v23, %v223_v15  ;;  %v236_v32 = vadd.f32 %v235_v24, %v234_v16  ;;  %v245_v33 = vadd.f32 %v244_v25, %v243_v17 }
  0x55   :  { %179 = vst [vmem:[#allocation7 + $0x4] sm:$0x1] %v178_v26  ;;  %vm249_vm15 = vcmp.eq.s32.totalorder %v922_v37, 8  ;;  %vm269_vm0 = vcmp.eq.s32.totalorder %v922_v37, 9  ;;  %vm289_vm1 = vcmp.eq.s32.totalorder %v922_v37, 10  ;;  %vm309_vm2 = vcmp.eq.s32.totalorder %v922_v37, 11 }
  0x56   :  { %188 = vst [vmem:[#allocation8 + $0x4] sm:$0x1] %v187_v27  ;;  %v217_v34 = vrot.slane %v216_v30, 1  ;;  %v226_v35 = vrot.slane %v225_v31, 1  ;;  %v237_v38 = vrot.slane %v236_v32, 1  ;;  %v246_v39 = vrot.slane %v245_v33, 1 }
  0x57   :  { %199 = vst [vmem:[#allocation7 + $0x5] sm:$0x1] %v198_v28  ;;  %v740_v40 = vsel %vm249_vm15, 1.0, %v885_v7  ;;  %v260_v41 = vsel %vm249_vm15, %v920_v36, 0.0  ;;  %v741_v42 = vsel %vm269_vm0, 1.0, %v885_v7  ;;  %v280_v43 = vsel %vm269_vm0, %v920_v36, 0.0 }
  0x58   :  { %208 = vst [vmem:[#allocation8 + $0x5] sm:$0x1] %v207_v29  ;;  %v218_v44 = vadd.f32 %v217_v34, %v216_v30  ;;  %v227_v45 = vadd.f32 %v226_v35, %v225_v31  ;;  %v238_v46 = vadd.f32 %v237_v38, %v236_v32  ;;  %v247_v47 = vadd.f32 %v246_v39, %v245_v33 }
  0x59   :  { %v252_v48 = vsel %vm91_vm6, %v740_v40, 0.0  ;;  %v261_v49 = vsel %vm91_vm6, %v260_v41, 0.0  ;;  %v272_v50 = vsel %vm91_vm6, %v741_v42, 0.0  ;;  %v281_v51 = vsel %vm91_vm6, %v280_v43, 0.0 }
  0x5a   :  { %219 = vst [vmem:[#allocation7 + $0x6] sm:$0x1] %v218_v44  ;;  %v253_v52 = vrot.slane %v252_v48, 4  ;;  %v262_v53 = vrot.slane %v261_v49, 4  ;;  %v273_v54 = vrot.slane %v272_v50, 4  ;;  %v282_v55 = vrot.slane %v281_v51, 4 }
  0x5b   :  { %228 = vst [vmem:[#allocation8 + $0x6] sm:$0x1] %v227_v45  ;;  %v742_v56 = vsel %vm289_vm1, 1.0, %v885_v7  ;;  %v300_v57 = vsel %vm289_vm1, %v920_v36, 0.0  ;;  %v743_v58 = vsel %vm309_vm2, 1.0, %v885_v7  ;;  %v320_v59 = vsel %vm309_vm2, %v920_v36, 0.0 }
  0x5c   :  { %239 = vst [vmem:[#allocation7 + $0x7] sm:$0x1] %v238_v46  ;;  %v254_v60 = vadd.f32 %v253_v52, %v252_v48  ;;  %v263_v61 = vadd.f32 %v262_v53, %v261_v49  ;;  %v274_v62 = vadd.f32 %v273_v54, %v272_v50  ;;  %v283_v63 = vadd.f32 %v282_v55, %v281_v51 }
  0x5d   :  { %248 = vst [vmem:[#allocation8 + $0x7] sm:$0x1] %v247_v47  ;;  %v292_v0 = vsel %vm91_vm6, %v742_v56, 0.0  ;;  %v301_v1 = vsel %vm91_vm6, %v300_v57, 0.0  ;;  %v312_v2 = vsel %vm91_vm6, %v743_v58, 0.0  ;;  %v321_v3 = vsel %vm91_vm6, %v320_v59, 0.0 }
  0x5e   :  { %v255_v4 = vrot.slane %v254_v60, 2  ;;  %v264_v5 = vrot.slane %v263_v61, 2  ;;  %v275_v6 = vrot.slane %v274_v62, 2  ;;  %v284_v8 = vrot.slane %v283_v63, 2 }
  0x5f   :  { %v293_v9 = vrot.slane %v292_v0, 4  ;;  %v302_v10 = vrot.slane %v301_v1, 4  ;;  %v313_v11 = vrot.slane %v312_v2, 4  ;;  %v322_v12 = vrot.slane %v321_v3, 4 }
  0x60   :  { %v256_v13 = vadd.f32 %v255_v4, %v254_v60  ;;  %v265_v14 = vadd.f32 %v264_v5, %v263_v61  ;;  %v276_v15 = vadd.f32 %v275_v6, %v274_v62  ;;  %v285_v16 = vadd.f32 %v284_v8, %v283_v63 }
  0x61   :  { %v294_v17 = vadd.f32 %v293_v9, %v292_v0  ;;  %v303_v18 = vadd.f32 %v302_v10, %v301_v1  ;;  %v314_v19 = vadd.f32 %v313_v11, %v312_v2  ;;  %v323_v20 = vadd.f32 %v322_v12, %v321_v3 }
  0x62   :  { %v257_v21 = vrot.slane %v256_v13, 1  ;;  %v266_v22 = vrot.slane %v265_v14, 1  ;;  %v277_v23 = vrot.slane %v276_v15, 1  ;;  %v286_v24 = vrot.slane %v285_v16, 1 }
  0x63   :  { %v295_v25 = vrot.slane %v294_v17, 2  ;;  %v304_v26 = vrot.slane %v303_v18, 2  ;;  %v315_v27 = vrot.slane %v314_v19, 2  ;;  %v324_v28 = vrot.slane %v323_v20, 2 }
  0x64   :  { %v258_v29 = vadd.f32 %v257_v21, %v256_v13  ;;  %v267_v30 = vadd.f32 %v266_v22, %v265_v14  ;;  %v278_v31 = vadd.f32 %v277_v23, %v276_v15  ;;  %v287_v32 = vadd.f32 %v286_v24, %v285_v16 }
  0x65   :  { %v296_v33 = vadd.f32 %v295_v25, %v294_v17  ;;  %v305_v34 = vadd.f32 %v304_v26, %v303_v18  ;;  %v316_v35 = vadd.f32 %v315_v27, %v314_v19  ;;  %v325_v38 = vadd.f32 %v324_v28, %v323_v20 }
  0x66   :  { %259 = vst [vmem:[#allocation7 + $0x8] sm:$0x1] %v258_v29  ;;  %vm329_vm3 = vcmp.eq.s32.totalorder %v922_v37, 12  ;;  %vm349_vm4 = vcmp.eq.s32.totalorder %v922_v37, 13  ;;  %vm369_vm5 = vcmp.eq.s32.totalorder %v922_v37, 14  ;;  %vm389_vm7 = vcmp.eq.s32.totalorder %v922_v37, 15 }
  0x67   :  { %268 = vst [vmem:[#allocation8 + $0x8] sm:$0x1] %v267_v30  ;;  %v297_v39 = vrot.slane %v296_v33, 1  ;;  %v306_v40 = vrot.slane %v305_v34, 1  ;;  %v317_v41 = vrot.slane %v316_v35, 1  ;;  %v326_v42 = vrot.slane %v325_v38, 1 }
  0x68   :  { %279 = vst [vmem:[#allocation7 + $0x9] sm:$0x1] %v278_v31  ;;  %v744_v43 = vsel %vm329_vm3, 1.0, %v885_v7  ;;  %v340_v44 = vsel %vm329_vm3, %v920_v36, 0.0  ;;  %v745_v45 = vsel %vm349_vm4, 1.0, %v885_v7  ;;  %v360_v46 = vsel %vm349_vm4, %v920_v36, 0.0 }
  0x69   :  { %288 = vst [vmem:[#allocation8 + $0x9] sm:$0x1] %v287_v32  ;;  %v298_v47 = vadd.f32 %v297_v39, %v296_v33  ;;  %v307_v48 = vadd.f32 %v306_v40, %v305_v34  ;;  %v318_v49 = vadd.f32 %v317_v41, %v316_v35  ;;  %v327_v50 = vadd.f32 %v326_v42, %v325_v38 }
  0x6a   :  { %v332_v51 = vsel %vm91_vm6, %v744_v43, 0.0  ;;  %v341_v52 = vsel %vm91_vm6, %v340_v44, 0.0  ;;  %v352_v53 = vsel %vm91_vm6, %v745_v45, 0.0  ;;  %v361_v54 = vsel %vm91_vm6, %v360_v46, 0.0 }
  0x6b   :  { %299 = vst [vmem:[#allocation7 + $0xa] sm:$0x1] %v298_v47  ;;  %v333_v55 = vrot.slane %v332_v51, 4  ;;  %v342_v56 = vrot.slane %v341_v52, 4  ;;  %v353_v57 = vrot.slane %v352_v53, 4  ;;  %v362_v58 = vrot.slane %v361_v54, 4 }
  0x6c   :  { %308 = vst [vmem:[#allocation8 + $0xa] sm:$0x1] %v307_v48  ;;  %v746_v59 = vsel %vm369_vm5, 1.0, %v885_v7  ;;  %v380_v60 = vsel %vm369_vm5, %v920_v36, 0.0  ;;  %v747_v61 = vsel %vm389_vm7, 1.0, %v885_v7  ;;  %v400_v62 = vsel %vm389_vm7, %v920_v36, 0.0 }
  0x6d   :  { %319 = vst [vmem:[#allocation7 + $0xb] sm:$0x1] %v318_v49  ;;  %v334_v63 = vadd.f32 %v333_v55, %v332_v51  ;;  %v343_v0 = vadd.f32 %v342_v56, %v341_v52  ;;  %v354_v1 = vadd.f32 %v353_v57, %v352_v53  ;;  %v363_v2 = vadd.f32 %v362_v58, %v361_v54 }
  0x6e   :  { %328 = vst [vmem:[#allocation8 + $0xb] sm:$0x1] %v327_v50  ;;  %v372_v3 = vsel %vm91_vm6, %v746_v59, 0.0  ;;  %v381_v4 = vsel %vm91_vm6, %v380_v60, 0.0  ;;  %v392_v5 = vsel %vm91_vm6, %v747_v61, 0.0  ;;  %v401_v6 = vsel %vm91_vm6, %v400_v62, 0.0 }
  0x6f   :  { %v335_v8 = vrot.slane %v334_v63, 2  ;;  %v344_v9 = vrot.slane %v343_v0, 2  ;;  %v355_v10 = vrot.slane %v354_v1, 2  ;;  %v364_v11 = vrot.slane %v363_v2, 2 }
  0x70   :  { %v373_v12 = vrot.slane %v372_v3, 4  ;;  %v382_v13 = vrot.slane %v381_v4, 4  ;;  %v393_v14 = vrot.slane %v392_v5, 4  ;;  %v402_v15 = vrot.slane %v401_v6, 4 }
  0x71   :  { %v336_v16 = vadd.f32 %v335_v8, %v334_v63  ;;  %v345_v17 = vadd.f32 %v344_v9, %v343_v0  ;;  %v356_v18 = vadd.f32 %v355_v10, %v354_v1  ;;  %v365_v19 = vadd.f32 %v364_v11, %v363_v2 }
  0x72   :  { %v374_v20 = vadd.f32 %v373_v12, %v372_v3  ;;  %v383_v21 = vadd.f32 %v382_v13, %v381_v4  ;;  %v394_v22 = vadd.f32 %v393_v14, %v392_v5  ;;  %v403_v23 = vadd.f32 %v402_v15, %v401_v6 }
  0x73   :  { %v337_v24 = vrot.slane %v336_v16, 1  ;;  %v346_v25 = vrot.slane %v345_v17, 1  ;;  %v357_v26 = vrot.slane %v356_v18, 1  ;;  %v366_v27 = vrot.slane %v365_v19, 1 }
  0x74   :  { %v375_v28 = vrot.slane %v374_v20, 2  ;;  %v384_v29 = vrot.slane %v383_v21, 2  ;;  %v395_v30 = vrot.slane %v394_v22, 2  ;;  %v404_v31 = vrot.slane %v403_v23, 2 }
  0x75   :  { %v338_v32 = vadd.f32 %v337_v24, %v336_v16  ;;  %v347_v33 = vadd.f32 %v346_v25, %v345_v17  ;;  %v358_v34 = vadd.f32 %v357_v26, %v356_v18  ;;  %v367_v35 = vadd.f32 %v366_v27, %v365_v19 }
  0x76   :  { %v376_v38 = vadd.f32 %v375_v28, %v374_v20  ;;  %v385_v39 = vadd.f32 %v384_v29, %v383_v21  ;;  %v396_v40 = vadd.f32 %v395_v30, %v394_v22  ;;  %v405_v41 = vadd.f32 %v404_v31, %v403_v23 }
  0x77   :  { %339 = vst [vmem:[#allocation7 + $0xc] sm:$0x1] %v338_v32  ;;  %vm409_vm8 = vcmp.eq.s32.totalorder %v922_v37, 16  ;;  %vm429_vm9 = vcmp.eq.s32.totalorder %v922_v37, 17  ;;  %vm449_vm10 = vcmp.eq.s32.totalorder %v922_v37, 18  ;;  %vm469_vm11 = vcmp.eq.s32.totalorder %v922_v37, 19 }
  0x78   :  { %348 = vst [vmem:[#allocation8 + $0xc] sm:$0x1] %v347_v33  ;;  %v377_v42 = vrot.slane %v376_v38, 1  ;;  %v386_v43 = vrot.slane %v385_v39, 1  ;;  %v397_v44 = vrot.slane %v396_v40, 1  ;;  %v406_v45 = vrot.slane %v405_v41, 1 }
  0x79   :  { %359 = vst [vmem:[#allocation7 + $0xd] sm:$0x1] %v358_v34  ;;  %v748_v46 = vsel %vm409_vm8, 1.0, %v885_v7  ;;  %v420_v47 = vsel %vm409_vm8, %v920_v36, 0.0  ;;  %v749_v48 = vsel %vm429_vm9, 1.0, %v885_v7  ;;  %v440_v49 = vsel %vm429_vm9, %v920_v36, 0.0 }
  0x7a   :  { %368 = vst [vmem:[#allocation8 + $0xd] sm:$0x1] %v367_v35  ;;  %v378_v50 = vadd.f32 %v377_v42, %v376_v38  ;;  %v387_v51 = vadd.f32 %v386_v43, %v385_v39  ;;  %v398_v52 = vadd.f32 %v397_v44, %v396_v40  ;;  %v407_v53 = vadd.f32 %v406_v45, %v405_v41 }
  0x7b   :  { %v412_v54 = vsel %vm91_vm6, %v748_v46, 0.0  ;;  %v421_v55 = vsel %vm91_vm6, %v420_v47, 0.0  ;;  %v432_v56 = vsel %vm91_vm6, %v749_v48, 0.0  ;;  %v441_v57 = vsel %vm91_vm6, %v440_v49, 0.0 }
  0x7c   :  { %379 = vst [vmem:[#allocation7 + $0xe] sm:$0x1] %v378_v50  ;;  %v413_v58 = vrot.slane %v412_v54, 4  ;;  %v422_v59 = vrot.slane %v421_v55, 4  ;;  %v433_v60 = vrot.slane %v432_v56, 4  ;;  %v442_v61 = vrot.slane %v441_v57, 4 }
  0x7d   :  { %388 = vst [vmem:[#allocation8 + $0xe] sm:$0x1] %v387_v51  ;;  %v750_v62 = vsel %vm449_vm10, 1.0, %v885_v7  ;;  %v460_v63 = vsel %vm449_vm10, %v920_v36, 0.0  ;;  %v751_v0 = vsel %vm469_vm11, 1.0, %v885_v7  ;;  %v480_v1 = vsel %vm469_vm11, %v920_v36, 0.0 }
  0x7e   :  { %399 = vst [vmem:[#allocation7 + $0xf] sm:$0x1] %v398_v52  ;;  %v414_v2 = vadd.f32 %v413_v58, %v412_v54  ;;  %v423_v3 = vadd.f32 %v422_v59, %v421_v55  ;;  %v434_v4 = vadd.f32 %v433_v60, %v432_v56  ;;  %v443_v5 = vadd.f32 %v442_v61, %v441_v57 }
  0x7f   :  { %408 = vst [vmem:[#allocation8 + $0xf] sm:$0x1] %v407_v53  ;;  %v452_v6 = vsel %vm91_vm6, %v750_v62, 0.0  ;;  %v461_v8 = vsel %vm91_vm6, %v460_v63, 0.0  ;;  %v472_v9 = vsel %vm91_vm6, %v751_v0, 0.0  ;;  %v481_v10 = vsel %vm91_vm6, %v480_v1, 0.0 }
  0x80   :  { %v415_v11 = vrot.slane %v414_v2, 2  ;;  %v424_v12 = vrot.slane %v423_v3, 2  ;;  %v435_v13 = vrot.slane %v434_v4, 2  ;;  %v444_v14 = vrot.slane %v443_v5, 2 }
  0x81   :  { %v453_v15 = vrot.slane %v452_v6, 4  ;;  %v462_v16 = vrot.slane %v461_v8, 4  ;;  %v473_v17 = vrot.slane %v472_v9, 4  ;;  %v482_v18 = vrot.slane %v481_v10, 4 }
  0x82   :  { %v416_v19 = vadd.f32 %v415_v11, %v414_v2  ;;  %v425_v20 = vadd.f32 %v424_v12, %v423_v3  ;;  %v436_v21 = vadd.f32 %v435_v13, %v434_v4  ;;  %v445_v22 = vadd.f32 %v444_v14, %v443_v5 }
  0x83   :  { %v454_v23 = vadd.f32 %v453_v15, %v452_v6  ;;  %v463_v24 = vadd.f32 %v462_v16, %v461_v8  ;;  %v474_v25 = vadd.f32 %v473_v17, %v472_v9  ;;  %v483_v26 = vadd.f32 %v482_v18, %v481_v10 }
  0x84   :  { %v417_v27 = vrot.slane %v416_v19, 1  ;;  %v426_v28 = vrot.slane %v425_v20, 1  ;;  %v437_v29 = vrot.slane %v436_v21, 1  ;;  %v446_v30 = vrot.slane %v445_v22, 1 }
  0x85   :  { %v455_v31 = vrot.slane %v454_v23, 2  ;;  %v464_v32 = vrot.slane %v463_v24, 2  ;;  %v475_v33 = vrot.slane %v474_v25, 2  ;;  %v484_v34 = vrot.slane %v483_v26, 2 }
  0x86   :  { %v418_v35 = vadd.f32 %v417_v27, %v416_v19  ;;  %v427_v38 = vadd.f32 %v426_v28, %v425_v20  ;;  %v438_v39 = vadd.f32 %v437_v29, %v436_v21  ;;  %v447_v40 = vadd.f32 %v446_v30, %v445_v22 }
  0x87   :  { %v456_v41 = vadd.f32 %v455_v31, %v454_v23  ;;  %v465_v42 = vadd.f32 %v464_v32, %v463_v24  ;;  %v476_v43 = vadd.f32 %v475_v33, %v474_v25  ;;  %v485_v44 = vadd.f32 %v484_v34, %v483_v26 }
  0x88   :  { %419 = vst [vmem:[#allocation7 + $0x10] sm:$0x1] %v418_v35  ;;  %vm489_vm12 = vcmp.eq.s32.totalorder %v922_v37, 20  ;;  %vm509_vm13 = vcmp.eq.s32.totalorder %v922_v37, 21  ;;  %vm529_vm14 = vcmp.eq.s32.totalorder %v922_v37, 22  ;;  %vm549_vm15 = vcmp.eq.s32.totalorder %v922_v37, 23 }
  0x89   :  { %428 = vst [vmem:[#allocation8 + $0x10] sm:$0x1] %v427_v38  ;;  %v457_v45 = vrot.slane %v456_v41, 1  ;;  %v466_v46 = vrot.slane %v465_v42, 1  ;;  %v477_v47 = vrot.slane %v476_v43, 1  ;;  %v486_v48 = vrot.slane %v485_v44, 1 }
  0x8a   :  { %439 = vst [vmem:[#allocation7 + $0x11] sm:$0x1] %v438_v39  ;;  %v752_v49 = vsel %vm489_vm12, 1.0, %v885_v7  ;;  %v500_v50 = vsel %vm489_vm12, %v920_v36, 0.0  ;;  %v753_v51 = vsel %vm509_vm13, 1.0, %v885_v7  ;;  %v520_v52 = vsel %vm509_vm13, %v920_v36, 0.0 }
  0x8b   :  { %448 = vst [vmem:[#allocation8 + $0x11] sm:$0x1] %v447_v40  ;;  %v458_v53 = vadd.f32 %v457_v45, %v456_v41  ;;  %v467_v54 = vadd.f32 %v466_v46, %v465_v42  ;;  %v478_v55 = vadd.f32 %v477_v47, %v476_v43  ;;  %v487_v56 = vadd.f32 %v486_v48, %v485_v44 }
  0x8c   :  { %v492_v57 = vsel %vm91_vm6, %v752_v49, 0.0  ;;  %v501_v58 = vsel %vm91_vm6, %v500_v50, 0.0  ;;  %v512_v59 = vsel %vm91_vm6, %v753_v51, 0.0  ;;  %v521_v60 = vsel %vm91_vm6, %v520_v52, 0.0 }
  0x8d   :  { %459 = vst [vmem:[#allocation7 + $0x12] sm:$0x1] %v458_v53  ;;  %v493_v61 = vrot.slane %v492_v57, 4  ;;  %v502_v62 = vrot.slane %v501_v58, 4  ;;  %v513_v63 = vrot.slane %v512_v59, 4  ;;  %v522_v0 = vrot.slane %v521_v60, 4 }
  0x8e   :  { %468 = vst [vmem:[#allocation8 + $0x12] sm:$0x1] %v467_v54  ;;  %v754_v1 = vsel %vm529_vm14, 1.0, %v885_v7  ;;  %v540_v2 = vsel %vm529_vm14, %v920_v36, 0.0  ;;  %v755_v3 = vsel %vm549_vm15, 1.0, %v885_v7  ;;  %v560_v4 = vsel %vm549_vm15, %v920_v36, 0.0 }
  0x8f   :  { %479 = vst [vmem:[#allocation7 + $0x13] sm:$0x1] %v478_v55  ;;  %v494_v5 = vadd.f32 %v493_v61, %v492_v57  ;;  %v503_v6 = vadd.f32 %v502_v62, %v501_v58  ;;  %v514_v8 = vadd.f32 %v513_v63, %v512_v59  ;;  %v523_v9 = vadd.f32 %v522_v0, %v521_v60 }
  0x90   :  { %488 = vst [vmem:[#allocation8 + $0x13] sm:$0x1] %v487_v56  ;;  %v532_v10 = vsel %vm91_vm6, %v754_v1, 0.0  ;;  %v541_v11 = vsel %vm91_vm6, %v540_v2, 0.0  ;;  %v552_v12 = vsel %vm91_vm6, %v755_v3, 0.0  ;;  %v561_v13 = vsel %vm91_vm6, %v560_v4, 0.0 }
  0x91   :  { %v495_v14 = vrot.slane %v494_v5, 2  ;;  %v504_v15 = vrot.slane %v503_v6, 2  ;;  %v515_v16 = vrot.slane %v514_v8, 2  ;;  %v524_v17 = vrot.slane %v523_v9, 2 }
  0x92   :  { %v533_v18 = vrot.slane %v532_v10, 4  ;;  %v542_v19 = vrot.slane %v541_v11, 4  ;;  %v553_v20 = vrot.slane %v552_v12, 4  ;;  %v562_v21 = vrot.slane %v561_v13, 4 }
  0x93   :  { %v496_v22 = vadd.f32 %v495_v14, %v494_v5  ;;  %v505_v23 = vadd.f32 %v504_v15, %v503_v6  ;;  %v516_v24 = vadd.f32 %v515_v16, %v514_v8  ;;  %v525_v25 = vadd.f32 %v524_v17, %v523_v9 }
  0x94   :  { %v534_v26 = vadd.f32 %v533_v18, %v532_v10  ;;  %v543_v27 = vadd.f32 %v542_v19, %v541_v11  ;;  %v554_v28 = vadd.f32 %v553_v20, %v552_v12  ;;  %v563_v29 = vadd.f32 %v562_v21, %v561_v13 }
  0x95   :  { %v497_v30 = vrot.slane %v496_v22, 1  ;;  %v506_v31 = vrot.slane %v505_v23, 1  ;;  %v517_v32 = vrot.slane %v516_v24, 1  ;;  %v526_v33 = vrot.slane %v525_v25, 1 }
  0x96   :  { %v535_v34 = vrot.slane %v534_v26, 2  ;;  %v544_v35 = vrot.slane %v543_v27, 2  ;;  %v555_v38 = vrot.slane %v554_v28, 2  ;;  %v564_v39 = vrot.slane %v563_v29, 2 }
  0x97   :  { %v498_v40 = vadd.f32 %v497_v30, %v496_v22  ;;  %v507_v41 = vadd.f32 %v506_v31, %v505_v23  ;;  %v518_v42 = vadd.f32 %v517_v32, %v516_v24  ;;  %v527_v43 = vadd.f32 %v526_v33, %v525_v25 }
  0x98   :  { %v536_v44 = vadd.f32 %v535_v34, %v534_v26  ;;  %v545_v45 = vadd.f32 %v544_v35, %v543_v27  ;;  %v556_v46 = vadd.f32 %v555_v38, %v554_v28  ;;  %v565_v47 = vadd.f32 %v564_v39, %v563_v29 }
  0x99   :  { %499 = vst [vmem:[#allocation7 + $0x14] sm:$0x1] %v498_v40  ;;  %vm569_vm0 = vcmp.eq.s32.totalorder %v922_v37, 24  ;;  %vm589_vm1 = vcmp.eq.s32.totalorder %v922_v37, 25  ;;  %vm609_vm2 = vcmp.eq.s32.totalorder %v922_v37, 26  ;;  %vm629_vm3 = vcmp.eq.s32.totalorder %v922_v37, 27 }
  0x9a   :  { %508 = vst [vmem:[#allocation8 + $0x14] sm:$0x1] %v507_v41  ;;  %v537_v48 = vrot.slane %v536_v44, 1  ;;  %v546_v49 = vrot.slane %v545_v45, 1  ;;  %v557_v50 = vrot.slane %v556_v46, 1  ;;  %v566_v51 = vrot.slane %v565_v47, 1 }
  0x9b   :  { %519 = vst [vmem:[#allocation7 + $0x15] sm:$0x1] %v518_v42  ;;  %v756_v52 = vsel %vm569_vm0, 1.0, %v885_v7  ;;  %v580_v53 = vsel %vm569_vm0, %v920_v36, 0.0  ;;  %v757_v54 = vsel %vm589_vm1, 1.0, %v885_v7  ;;  %v600_v55 = vsel %vm589_vm1, %v920_v36, 0.0 }
  0x9c   :  { %528 = vst [vmem:[#allocation8 + $0x15] sm:$0x1] %v527_v43  ;;  %v538_v56 = vadd.f32 %v537_v48, %v536_v44  ;;  %v547_v57 = vadd.f32 %v546_v49, %v545_v45  ;;  %v558_v58 = vadd.f32 %v557_v50, %v556_v46  ;;  %v567_v59 = vadd.f32 %v566_v51, %v565_v47 }
  0x9d   :  { %v572_v60 = vsel %vm91_vm6, %v756_v52, 0.0  ;;  %v581_v61 = vsel %vm91_vm6, %v580_v53, 0.0  ;;  %v592_v62 = vsel %vm91_vm6, %v757_v54, 0.0  ;;  %v601_v63 = vsel %vm91_vm6, %v600_v55, 0.0 }
  0x9e   :  { %539 = vst [vmem:[#allocation7 + $0x16] sm:$0x1] %v538_v56  ;;  %v573_v0 = vrot.slane %v572_v60, 4  ;;  %v582_v1 = vrot.slane %v581_v61, 4  ;;  %v593_v2 = vrot.slane %v592_v62, 4  ;;  %v602_v3 = vrot.slane %v601_v63, 4 }
  0x9f   :  { %548 = vst [vmem:[#allocation8 + $0x16] sm:$0x1] %v547_v57  ;;  %v758_v4 = vsel %vm609_vm2, 1.0, %v885_v7  ;;  %v620_v5 = vsel %vm609_vm2, %v920_v36, 0.0  ;;  %v759_v6 = vsel %vm629_vm3, 1.0, %v885_v7  ;;  %v640_v8 = vsel %vm629_vm3, %v920_v36, 0.0 }
  0xa0   :  { %559 = vst [vmem:[#allocation7 + $0x17] sm:$0x1] %v558_v58  ;;  %v574_v9 = vadd.f32 %v573_v0, %v572_v60  ;;  %v583_v10 = vadd.f32 %v582_v1, %v581_v61  ;;  %v594_v11 = vadd.f32 %v593_v2, %v592_v62  ;;  %v603_v12 = vadd.f32 %v602_v3, %v601_v63 }
  0xa1   :  { %568 = vst [vmem:[#allocation8 + $0x17] sm:$0x1] %v567_v59  ;;  %v612_v13 = vsel %vm91_vm6, %v758_v4, 0.0  ;;  %v621_v14 = vsel %vm91_vm6, %v620_v5, 0.0  ;;  %v632_v15 = vsel %vm91_vm6, %v759_v6, 0.0  ;;  %v641_v16 = vsel %vm91_vm6, %v640_v8, 0.0 }
  0xa2   :  { %v575_v17 = vrot.slane %v574_v9, 2  ;;  %v584_v18 = vrot.slane %v583_v10, 2  ;;  %v595_v19 = vrot.slane %v594_v11, 2  ;;  %v604_v20 = vrot.slane %v603_v12, 2 }
  0xa3   :  { %v613_v21 = vrot.slane %v612_v13, 4  ;;  %v622_v22 = vrot.slane %v621_v14, 4  ;;  %v633_v23 = vrot.slane %v632_v15, 4  ;;  %v642_v24 = vrot.slane %v641_v16, 4 }
  0xa4   :  { %v576_v25 = vadd.f32 %v575_v17, %v574_v9  ;;  %v585_v26 = vadd.f32 %v584_v18, %v583_v10  ;;  %v596_v27 = vadd.f32 %v595_v19, %v594_v11  ;;  %v605_v28 = vadd.f32 %v604_v20, %v603_v12 }
  0xa5   :  { %v614_v29 = vadd.f32 %v613_v21, %v612_v13  ;;  %v623_v30 = vadd.f32 %v622_v22, %v621_v14  ;;  %v634_v31 = vadd.f32 %v633_v23, %v632_v15  ;;  %v643_v32 = vadd.f32 %v642_v24, %v641_v16 }
  0xa6   :  { %v577_v33 = vrot.slane %v576_v25, 1  ;;  %v586_v34 = vrot.slane %v585_v26, 1  ;;  %v597_v35 = vrot.slane %v596_v27, 1  ;;  %v606_v38 = vrot.slane %v605_v28, 1 }
  0xa7   :  { %v615_v39 = vrot.slane %v614_v29, 2  ;;  %v624_v40 = vrot.slane %v623_v30, 2  ;;  %v635_v41 = vrot.slane %v634_v31, 2  ;;  %v644_v42 = vrot.slane %v643_v32, 2 }
  0xa8   :  { %v578_v43 = vadd.f32 %v577_v33, %v576_v25  ;;  %v587_v44 = vadd.f32 %v586_v34, %v585_v26  ;;  %v598_v45 = vadd.f32 %v597_v35, %v596_v27  ;;  %v607_v46 = vadd.f32 %v606_v38, %v605_v28 }
  0xa9   :  { %v616_v47 = vadd.f32 %v615_v39, %v614_v29  ;;  %v625_v48 = vadd.f32 %v624_v40, %v623_v30  ;;  %v636_v49 = vadd.f32 %v635_v41, %v634_v31  ;;  %v645_v50 = vadd.f32 %v644_v42, %v643_v32 }
  0xaa   :  { %579 = vst [vmem:[#allocation7 + $0x18] sm:$0x1] %v578_v43  ;;  %vm649_vm4 = vcmp.eq.s32.totalorder %v922_v37, 28  ;;  %vm669_vm5 = vcmp.eq.s32.totalorder %v922_v37, 29 }
  0xab   :  { %588 = vst [vmem:[#allocation8 + $0x18] sm:$0x1] %v587_v44  ;;  %v617_v51 = vrot.slane %v616_v47, 1  ;;  %v626_v52 = vrot.slane %v625_v48, 1  ;;  %v637_v53 = vrot.slane %v636_v49, 1  ;;  %v646_v54 = vrot.slane %v645_v50, 1 }
  0xac   :  { %599 = vst [vmem:[#allocation7 + $0x19] sm:$0x1] %v598_v45  ;;  %v760_v55 = vsel %vm649_vm4, 1.0, %v885_v7  ;;  %v660_v56 = vsel %vm649_vm4, %v920_v36, 0.0  ;;  %v761_v57 = vsel %vm669_vm5, 1.0, %v885_v7  ;;  %v680_v58 = vsel %vm669_vm5, %v920_v36, 0.0 }
  0xad   :  { %608 = vst [vmem:[#allocation8 + $0x19] sm:$0x1] %v607_v46  ;;  %v618_v59 = vadd.f32 %v617_v51, %v616_v47  ;;  %v627_v60 = vadd.f32 %v626_v52, %v625_v48  ;;  %v638_v61 = vadd.f32 %v637_v53, %v636_v49  ;;  %v647_v62 = vadd.f32 %v646_v54, %v645_v50 }
  0xae   :  { %v652_v37 = vsel %vm91_vm6, %v760_v55, 0.0  ;;  %v661_v63 = vsel %vm91_vm6, %v660_v56, 0.0  ;;  %v672_v0 = vsel %vm91_vm6, %v761_v57, 0.0  ;;  %v681_v1 = vsel %vm91_vm6, %v680_v58, 0.0 }
  0xaf   :  { %619 = vst [vmem:[#allocation7 + $0x1a] sm:$0x1] %v618_v59  ;;  %v653_v2 = vrot.slane %v652_v37, 4  ;;  %v662_v3 = vrot.slane %v661_v63, 4  ;;  %v673_v4 = vrot.slane %v672_v0, 4  ;;  %v682_v7 = vrot.slane %v681_v1, 4 }
  0xb0   :  { %628 = vst [vmem:[#allocation8 + $0x1a] sm:$0x1] %v627_v60 }
  0xb1   :  { %639 = vst [vmem:[#allocation7 + $0x1b] sm:$0x1] %v638_v61  ;;  %v654_v36 = vadd.f32 %v653_v2, %v652_v37  ;;  %v663_v5 = vadd.f32 %v662_v3, %v661_v63  ;;  %v674_v6 = vadd.f32 %v673_v4, %v672_v0  ;;  %v683_v8 = vadd.f32 %v682_v7, %v681_v1 }
  0xb2   :  { %648 = vst [vmem:[#allocation8 + $0x1b] sm:$0x1] %v647_v62 }
  0xb3   :  { %v655_v9 = vrot.slane %v654_v36, 2  ;;  %v664_v10 = vrot.slane %v663_v5, 2  ;;  %v675_v11 = vrot.slane %v674_v6, 2  ;;  %v684_v12 = vrot.slane %v683_v8, 2 }
  0xb5   :  { %v656_v13 = vadd.f32 %v655_v9, %v654_v36  ;;  %v665_v14 = vadd.f32 %v664_v10, %v663_v5  ;;  %v676_v15 = vadd.f32 %v675_v11, %v674_v6  ;;  %v685_v16 = vadd.f32 %v684_v12, %v683_v8 }
  0xb7   :  { %v657_v17 = vrot.slane %v656_v13, 1  ;;  %v666_v18 = vrot.slane %v665_v14, 1  ;;  %v677_v19 = vrot.slane %v676_v15, 1  ;;  %v686_v20 = vrot.slane %v685_v16, 1 }
  0xb9   :  { %v658_v21 = vadd.f32 %v657_v17, %v656_v13  ;;  %v667_v22 = vadd.f32 %v666_v18, %v665_v14  ;;  %v678_v23 = vadd.f32 %v677_v19, %v676_v15  ;;  %v687_v24 = vadd.f32 %v686_v20, %v685_v16 }
  0xbb   :  { %659 = vst [vmem:[#allocation7 + $0x1c] sm:$0x1] %v658_v21 }
  0xbc   :  { %668 = vst [vmem:[#allocation8 + $0x1c] sm:$0x1] %v667_v22 }
  0xbd   :  { %679 = vst [vmem:[#allocation7 + $0x1d] sm:$0x1] %v678_v23 }
  0xbe   :  { %688 = vst [vmem:[#allocation8 + $0x1d] sm:$0x1] %v687_v24  ;;  %705 = dma.vmem_to_hbm [thread:$0]  %s698_s1, 512, %s700_s24, [#allocation4], %s888_s30, %s888_s30, %s889_s2  }
  0xbf   :  { %718 = dma.vmem_to_hbm [thread:$0]  %s711_s26, 512, %s713_s29, [#allocation9], %s888_s30, %s888_s30, %s889_s2  }
  0xc0   :  { %879 = dma.done.wait [#allocation4], 512  }
  0xc1   :  { %880 = vsyncadd [#allocation4], 4294966784 }
  0xc2   :  { %881 = dma.done.wait [#allocation9], 512  }
  0xc3   :  { %882 = vsyncadd [#allocation9], 4294966784 }
  0xc4   :  { %727 = vsyncpa [#allocation3], 1 }
  0xc5   :  { %728 = vsyncpa [#allocation6], 1 }
  0xc6   :  { %729 = vsyncpa [#allocation4], 1 }
  0xc7   :  { %730 = vsyncpa [#allocation9], 1 }

</bundles_post_ra>
